<compile_context>
chip_gen: v5e
topology: v5e:2x2
jax: 0.10.0
libtpu: 0.0.40
codegen_flags: <defaults>
</compile_context>

<pallas_src>
import jax
import jax.numpy as jnp
from jax import lax
from jax.experimental import pallas as pl
from jax.experimental.pallas import tpu as pltpu


# ---------------------------------------------------------------------------
# Kernel 1: fused per-kv-group QKV projection + interleaved RoPE.
# grid = (n_kv_heads, seq_tiles); the fused weight block stays resident across
# the inner (sequence-tile) axis.
# ---------------------------------------------------------------------------
def _qkv_rope_kernel(x_ref, w_ref, cos_ref, sin_ref, q_ref, kv_ref):
    R, _, hd = q_ref.shape
    cos = cos_ref[...]
    sin = sin_ref[...]

    # One fused (TS, D) @ (D, (R+2)*hd) matmul: [R query heads | K | V] for this
    # kv group.  Softmax scale is already folded into the Q weight columns.
    qkv = jnp.dot(x_ref[...], w_ref[...], preferred_element_type=jnp.float32)

    # Rotate-half RoPE (weights were de-interleaved to [evens..., odds...]).
    def rope(t):
        return t * cos + pltpu.roll(t, shift=hd // 2, axis=1) * sin

    for r in range(R):                                           # static unroll
        q_ref[r, :, :] = rope(qkv[:, r * hd:(r + 1) * hd]).astype(q_ref.dtype)

    kv_ref[0, :, 0:hd] = rope(qkv[:, R * hd:(R + 1) * hd]).astype(kv_ref.dtype)
    kv_ref[0, :, hd:2 * hd] = qkv[:, (R + 1) * hd:(R + 2) * hd].astype(kv_ref.dtype)


# ---------------------------------------------------------------------------
# Kernel 2: GQA flash attention (online softmax) + output projection.
# grid = (q_tiles, n_kv_heads, kv_tiles).  Output block is resident across the
# kv-head / kv-tile axes and accumulated in place (f32) - no out_sc scratch.
# ---------------------------------------------------------------------------
def _attention_kernel(q_ref, kv_ref, wo_ref, o_ref, m_sc, l_sc, ctx_sc):
    R, TQ, hd = q_ref.shape
    kvh = pl.program_id(1)
    kvt = pl.program_id(2)
    n_kvt = pl.num_programs(2)
    # Stacked (R*TQ, hd) path only when the (R, TQ, hd) -> (R*TQ, hd) collapse is
    # layout-free for bf16 (sublane pack = 16).
    stacked = (R == 1) or (TQ % 16 == 0)

    @pl.when((kvh == 0) & (kvt == 0))
    def _init_out():
        o_ref[...] = jnp.zeros_like(o_ref)

    @pl.when(kvt == 0)
    def _init_softmax():
        m_sc[...] = jnp.full_like(m_sc, -jnp.inf)
        l_sc[...] = jnp.zeros_like(l_sc)
        ctx_sc[...] = jnp.zeros_like(ctx_sc)

    kv = kv_ref[0]                      # (TK, 2*hd) bf16, projected+RoPE'd once
    k = kv[:, 0:hd]
    v = kv[:, hd:2 * hd]

    def online_update(q, rows):
        # q: (M, hd) bf16; rows: slice of the (R*TQ) softmax-state rows it owns.
        s = lax.dot_general(q, k, (((1,), (1,)), ((), ())),
                            preferred_element_type=jnp.float32)       # (M, TK)
        m_prev = m_sc[rows, :]
        m_new = jnp.maximum(m_prev, jnp.max(s, axis=-1, keepdims=True))
        alpha = jnp.exp(m_prev - m_new)
        p = jnp.exp(s - m_new)
        l_sc[rows, :] = alpha * l_sc[rows, :] + jnp.sum(p, axis=-1, keepdims=True)
        ctx_sc[rows, :] = alpha * ctx_sc[rows, :] + jnp.dot(
            p.astype(jnp.bfloat16), v, preferred_element_type=jnp.float32)
        m_sc[rows, :] = m_new

    if stacked:
        # All R heads as ONE tall matmul -> fewer MXU fill/drain boundaries.
        online_update(q_ref[...].reshape(R * TQ, hd), pl.ds(0, R * TQ))
    else:
        for r in range(R):                                       # static unroll
            online_update(q_ref[r], pl.ds(r * TQ, TQ))

    @pl.when(kvt == n_kvt - 1)
    def _epilogue():
        # Normalize after P@V (EUP reciprocal), fold this kv group's heads into
        # the resident output block via per-head (TQ, hd) @ (hd, D) matmuls.
        acc = o_ref[...].astype(jnp.float32)
        for r in range(R):
            rows = pl.ds(r * TQ, TQ)
            inv_l = pl.reciprocal(l_sc[rows, :], approx=True)        # (TQ, 1)
            ctx_n = (ctx_sc[rows, :] * inv_l).astype(jnp.bfloat16)   # (TQ, hd)
            acc = acc + jnp.dot(ctx_n, wo_ref[r],
                                preferred_element_type=jnp.float32)
        o_ref[...] = acc.astype(o_ref.dtype)


# ---------------------------------------------------------------------------
# Helpers
# ---------------------------------------------------------------------------
def _pick_tile(n, preferred):
    """Largest tile <= preferred dividing n; prefers multiples of 128, then 16,
    then 8.  Raises (instead of silently returning a VMEM-busting tile) when no
    suitable divisor exists."""
    if n <= preferred:
        return n
    for g in (128, 16, 8):
        t = (preferred // g) * g
        while t >= g:
            if n % t == 0:
                return t
            t -= g
    raise ValueError(
        f"sequence length {n} has no tile divisor <= {preferred} that is a "
        "multiple of 8; pad the sequence or adjust tile sizes")


def _vmem_limit_bytes(block_bytes, scratch_bytes=0):
    """Derive the VMEM request from the double-buffered block + scratch tally,
    with headroom for compiler-internal temporaries.  Never request the full
    physical VMEM (v7x only has 64 MiB)."""
    est = int((2 * block_bytes + scratch_bytes) * 1.25) + (4 << 20)
    try:
        cap = (pltpu.get_tpu_info().vmem_capacity_bytes * 7) // 8
    except Exception:
        cap = 56 << 20          # safe on every generation
    return int(max(16 << 20, min(est, cap)))


# ---------------------------------------------------------------------------
# Wrapper
# ---------------------------------------------------------------------------
def attention_forward(x, wq, wk, wv, wo, freqs_cos, freqs_sin,
                      n_heads, n_kv_heads, head_dim,
                      q_tile=256, kv_tile=512, proj_tile=512):
    """x: (S, D); wq: (H*hd, D); wk/wv: (KV*hd, D); wo: (D, H*hd)."""
    assert n_heads % n_kv_heads == 0
    S, D = x.shape
    hd = head_dim
    H, KV = n_heads, n_kv_heads
    R = H // KV
    scale = hd ** -0.5

    TS = _pick_tile(S, proj_tile)
    TQ = _pick_tile(S, q_tile)
    TK = _pick_tile(S, kv_tile)
    n_st, n_qt, n_kt = S // TS, S // TQ, S // TK

    # ---- one-time weight preprocessing (hoist to model state in prod) ----
    def deinterleave_cols(wt, n_h):
        # (D, n_h*hd) with per-head columns in interleaved (even, odd) pair
        # order -> rotate-half layout [evens..., odds...] per head.
        w = wt.reshape(D, n_h, hd // 2, 2)
        w = jnp.swapaxes(w, -1, -2)
        return w.reshape(D, n_h * hd)

    wq_g = (deinterleave_cols(wq.T, H) * scale).reshape(D, KV, R * hd)
    wk_g = deinterleave_cols(wk.T, KV).reshape(D, KV, hd)
    wv_g = wv.T.reshape(D, KV, hd)
    # Fused per-group projection weight: [R query heads | K | V] per kv group.
    w_qkv = jnp.concatenate([wq_g, wk_g, wv_g], axis=-1)
    w_qkv = w_qkv.reshape(D, KV * (R + 2) * hd).astype(jnp.bfloat16)
    wo_t = wo.T.reshape(H, hd, D).astype(jnp.bfloat16)
    x_bf = x.astype(jnp.bfloat16)

    # RoPE tables in rotate-half layout.
    cos = jnp.concatenate([freqs_cos, freqs_cos], axis=-1).astype(jnp.float32)
    sin = jnp.concatenate([-freqs_sin, freqs_sin], axis=-1).astype(jnp.float32)

    # -------------------- Kernel 1: QKV projection + RoPE --------------------
    k1_block_bytes = (TS * D * 2 + D * (R + 2) * hd * 2 + 2 * TS * hd * 4
                      + R * TS * hd * 2 + TS * 2 * hd * 2)
    q_rope, kv_rope = pl.pallas_call(
        _qkv_rope_kernel,
        out_shape=(jax.ShapeDtypeStruct((H, S, hd), jnp.bfloat16),
                   jax.ShapeDtypeStruct((KV, S, 2 * hd), jnp.bfloat16)),
        grid_spec=pltpu.PrefetchScalarGridSpec(
            num_scalar_prefetch=0,
            grid=(KV, n_st),       # kv group outer -> weight block stays resident
            in_specs=[
                pl.BlockSpec((TS, D), lambda g, st: (st, 0)),              # x
                pl.BlockSpec((D, (R + 2) * hd), lambda g, st: (0, g)),     # [wq|wk|wv]
                pl.BlockSpec((TS, hd), lambda g, st: (st, 0)),             # cos
                pl.BlockSpec((TS, hd), lambda g, st: (st, 0)),             # sin
            ],
            out_specs=(
                pl.BlockSpec((R, TS, hd), lambda g, st: (g, st, 0)),       # Q
                pl.BlockSpec((1, TS, 2 * hd), lambda g, st: (g, st, 0)),   # K|V
            ),
        ),
        compiler_params=pltpu.CompilerParams(
            dimension_semantics=("parallel", "parallel"),
            vmem_limit_bytes=_vmem_limit_bytes(k1_block_bytes)),
    )(x_bf, w_qkv, cos, sin)

    # ---------------- Kernel 2: flash attention + output proj ----------------
    k2_block_bytes = (R * TQ * hd * 2 + TK * 2 * hd * 2 + R * hd * D * 2
                      + TQ * D * 4)
    k2_scratch_bytes = 2 * R * TQ * 128 * 4 + R * TQ * hd * 4
    out = pl.pallas_call(
        _attention_kernel,
        out_shape=jax.ShapeDtypeStruct((S, D), x.dtype),
        grid_spec=pltpu.PrefetchScalarGridSpec(
            num_scalar_prefetch=0,
            grid=(n_qt, KV, n_kt),
            in_specs=[
                pl.BlockSpec((R, TQ, hd), lambda qt, g, kt: (g, qt, 0)),     # Q
                pl.BlockSpec((1, TK, 2 * hd), lambda qt, g, kt: (g, kt, 0)), # K|V
                pl.BlockSpec((R, hd, D), lambda qt, g, kt: (g, 0, 0)),       # wo rows
            ],
            out_specs=pl.BlockSpec((TQ, D), lambda qt, g, kt: (qt, 0)),
            scratch_shapes=[
                pltpu.VMEM((R * TQ, 1), jnp.float32),    # running max
                pltpu.VMEM((R * TQ, 1), jnp.float32),    # running denominator
                pltpu.VMEM((R * TQ, hd), jnp.float32),   # running P@V accumulator
            ],
        ),
        compiler_params=pltpu.CompilerParams(
            dimension_semantics=("parallel", "arbitrary", "arbitrary"),
            vmem_limit_bytes=_vmem_limit_bytes(k2_block_bytes, k2_scratch_bytes)),
    )(q_rope, kv_rope, wo_t)
    return out


# ---------------------------------------------------------------------------
# Pure-JAX reference (replica of the PyTorch forward, cache=None, attn_tp=False)
# ---------------------------------------------------------------------------
def attention_reference(x, wq, wk, wv, wo, freqs_cos, freqs_sin,
                        n_heads, n_kv_heads, head_dim):
    S, D = x.shape
    repeats = n_heads // n_kv_heads
    xq = (x @ wq.T).reshape(S, n_heads, head_dim)
    xk = (x @ wk.T).reshape(S, n_kv_heads, head_dim)
    xv = (x @ wv.T).reshape(S, n_kv_heads, head_dim)

    def rope(t):
        Sh, Hh, hd = t.shape
        tr = t.reshape(Sh, Hh, hd // 2, 2)
        a, b = tr[..., 0], tr[..., 1]
        c = freqs_cos[:, None, :]
        s = freqs_sin[:, None, :]
        return jnp.stack([a * c - b * s, a * s + b * c], axis=-1).reshape(Sh, Hh, hd)

    xq = rope(xq)
    xk = rope(xk)
    k = jnp.repeat(xk, repeats, axis=1)
    v = jnp.repeat(xv, repeats, axis=1)
    scale = head_dim ** -0.5
    scores = jnp.einsum('qhd,khd->hqk', xq, k) * scale
    p = jax.nn.softmax(scores, axis=-1)
    out = jnp.einsum('hqk,khd->qhd', p, v).reshape(S, n_heads * head_dim)
    return out @ wo.T


# TODO(synk): CacheView prefill/decode KV-cache paths (index_copy/interleave),
# the BlockDiagonal/causal masks they imply, and the attn_tp
# torch.distributed all_gather are host/runtime bookkeeping & collectives;
# only the cache=None, attn_tp=False (unmasked) forward is implemented here.

if __name__ == "__main__":
    # Small Mixtral-like config (GQA: 4 query heads, 2 kv heads, head_dim 128).
    S = 256
    D = 256
    n_heads = 4
    n_kv_heads = 2
    head_dim = 128
    rope_theta = 1e6

    key = jax.random.PRNGKey(0)
    kx, kq, kk, kv, ko = jax.random.split(key, 5)
    x = jax.random.normal(kx, (S, D), dtype=jnp.float32)
    wq = jax.random.normal(kq, (n_heads * head_dim, D), jnp.float32) * D ** -0.5
    wk = jax.random.normal(kk, (n_kv_heads * head_dim, D), jnp.float32) * D ** -0.5
    wv = jax.random.normal(kv, (n_kv_heads * head_dim, D), jnp.float32) * D ** -0.5
    wo = jax.random.normal(ko, (D, n_heads * head_dim), jnp.float32) \
        * (n_heads * head_dim) ** -0.5

    # freqs_cis for positions 0..S-1 (cache=None path).
    inv_freq = rope_theta ** (-jnp.arange(0, head_dim, 2, dtype=jnp.float32) / head_dim)
    t = jnp.arange(S, dtype=jnp.float32)
    angles = t[:, None] * inv_freq[None, :]            # (S, head_dim//2)
    freqs_cos = jnp.cos(angles)
    freqs_sin = jnp.sin(angles)

    # Tiles chosen so the test exercises multi-tile q / kv pipelining, the
    # cross-kv-head output accumulation, and the stacked (R*TQ, hd) path.
    out = attention_forward(x, wq, wk, wv, wo, freqs_cos, freqs_sin,
                            n_heads, n_kv_heads, head_dim,
                            q_tile=128, kv_tile=128, proj_tile=128)
    out = jax.block_until_ready(out)

    ref = attention_reference(x, wq, wk, wv, wo, freqs_cos, freqs_sin,
                              n_heads, n_kv_heads, head_dim)
    assert out.shape == (S, D)
    err = float(jnp.max(jnp.abs(out - ref)))
    # bf16 operands in the kernel vs. f32 reference -> looser tolerance.
    assert bool(jnp.allclose(out, ref, atol=1e-1, rtol=1e-1)), \
        f"max abs err = {err}"
    print("KERNEL_OK")
</pallas_src>

<mosaic_0001>
module attributes {stable_mosaic.version = 11 : i64} {
  func.func @_qkv_rope_kernel(%arg0: i32, %arg1: i32, %arg2: memref<128x256xbf16, #tpu.memory_space<vmem>>, %arg3: memref<256x512xbf16, #tpu.memory_space<vmem>>, %arg4: memref<128x128xf32, #tpu.memory_space<vmem>>, %arg5: memref<128x128xf32, #tpu.memory_space<vmem>>, %arg6: memref<2x128x128xbf16, #tpu.memory_space<vmem>>, %arg7: memref<1x128x256xbf16, #tpu.memory_space<vmem>>) attributes {dimension_semantics = [#tpu.dimension_semantics<parallel>, #tpu.dimension_semantics<parallel>], iteration_bounds = array<i64: 2, 2>, scalar_prefetch = 0 : i64, scratch_operands = 0 : i64, tpu.core_type = #tpu.core_type<tc>, window_params = [{transform_indices = @transform_0, window_bounds = array<i64: 128, 256>}, {transform_indices = @transform_1, window_bounds = array<i64: 256, 512>}, {transform_indices = @transform_2, window_bounds = array<i64: 128, 128>}, {transform_indices = @transform_3, window_bounds = array<i64: 128, 128>}, {transform_indices = @transform_4, window_bounds = array<i64: 2, 128, 128>}, {transform_indices = @transform_5, window_bounds = array<i64: 1, 128, 256>}]} {
    %c0 = arith.constant 0 : index
    %c0_0 = arith.constant 0 : index
    %0 = vector.load %arg4[%c0, %c0_0] : memref<128x128xf32, #tpu.memory_space<vmem>>, vector<128x128xf32>
    %c0_1 = arith.constant 0 : index
    %c0_2 = arith.constant 0 : index
    %1 = vector.load %arg5[%c0_1, %c0_2] : memref<128x128xf32, #tpu.memory_space<vmem>>, vector<128x128xf32>
    %c0_3 = arith.constant 0 : index
    %c0_4 = arith.constant 0 : index
    %2 = vector.load %arg2[%c0_3, %c0_4] : memref<128x256xbf16, #tpu.memory_space<vmem>>, vector<128x256xbf16>
    %c0_5 = arith.constant 0 : index
    %c0_6 = arith.constant 0 : index
    %3 = vector.load %arg3[%c0_5, %c0_6] : memref<256x512xbf16, #tpu.memory_space<vmem>>, vector<256x512xbf16>
    %cst = arith.constant dense<0.000000e+00> : vector<128x512xf32>
    %4 = tpu.matmul %2, %3, %cst {dimension_numbers = #tpu.dot_dimension_numbers<[1], [0], [0], [1], [0, 0, 1, 1], [], []>} : vector<128x256xbf16>, vector<256x512xbf16>, vector<128x512xf32> -> vector<128x512xf32>
    %5 = vector.extract_strided_slice %4 {offsets = [0, 0], sizes = [128, 128], strides = [1, 1]} : vector<128x512xf32> to vector<128x128xf32>
    %6 = arith.mulf %5, %0 : vector<128x128xf32>
    %c64_i32 = arith.constant 64 : i32
    %7 = tpu.dynamic_rotate %5 by %c64_i32 dim 1 : vector<128x128xf32>, i32 -> vector<128x128xf32>
    %8 = arith.mulf %7, %1 : vector<128x128xf32>
    %9 = arith.addf %6, %8 : vector<128x128xf32>
    %10 = arith.truncf %9 : vector<128x128xf32> to vector<128x128xbf16>
    %c0_7 = arith.constant 0 : index
    %c0_8 = arith.constant 0 : index
    %c0_9 = arith.constant 0 : index
    %11 = vector.load %arg6[%c0_7, %c0_8, %c0_9] : memref<2x128x128xbf16, #tpu.memory_space<vmem>>, vector<1x128x128xbf16>
    %12 = vector.shape_cast %11 : vector<1x128x128xbf16> to vector<128x128xbf16>
    %13 = vector.shape_cast %10 : vector<128x128xbf16> to vector<1x128x128xbf16>
    tpu.vector_store %arg6[%c0_7, %c0_8, %c0_9], %13 {strides = array<i32>} : memref<2x128x128xbf16, #tpu.memory_space<vmem>>, vector<1x128x128xbf16>,
    %14 = vector.extract_strided_slice %4 {offsets = [0, 128], sizes = [128, 128], strides = [1, 1]} : vector<128x512xf32> to vector<128x128xf32>
    %15 = arith.mulf %14, %0 : vector<128x128xf32>
    %c64_i32_10 = arith.constant 64 : i32
    %16 = tpu.dynamic_rotate %14 by %c64_i32_10 dim 1 : vector<128x128xf32>, i32 -> vector<128x128xf32>
    %17 = arith.mulf %16, %1 : vector<128x128xf32>
    %18 = arith.addf %15, %17 : vector<128x128xf32>
    %19 = arith.truncf %18 : vector<128x128xf32> to vector<128x128xbf16>
    %c1 = arith.constant 1 : index
    %c0_11 = arith.constant 0 : index
    %c0_12 = arith.constant 0 : index
    %20 = vector.load %arg6[%c1, %c0_11, %c0_12] : memref<2x128x128xbf16, #tpu.memory_space<vmem>>, vector<1x128x128xbf16>
    %21 = vector.shape_cast %20 : vector<1x128x128xbf16> to vector<128x128xbf16>
    %22 = vector.shape_cast %19 : vector<128x128xbf16> to vector<1x128x128xbf16>
    tpu.vector_store %arg6[%c1, %c0_11, %c0_12], %22 {strides = array<i32>} : memref<2x128x128xbf16, #tpu.memory_space<vmem>>, vector<1x128x128xbf16>,
    %23 = vector.extract_strided_slice %4 {offsets = [0, 256], sizes = [128, 128], strides = [1, 1]} : vector<128x512xf32> to vector<128x128xf32>
    %24 = arith.mulf %23, %0 : vector<128x128xf32>
    %c64_i32_13 = arith.constant 64 : i32
    %25 = tpu.dynamic_rotate %23 by %c64_i32_13 dim 1 : vector<128x128xf32>, i32 -> vector<128x128xf32>
    %26 = arith.mulf %25, %1 : vector<128x128xf32>
    %27 = arith.addf %24, %26 : vector<128x128xf32>
    %28 = arith.truncf %27 : vector<128x128xf32> to vector<128x128xbf16>
    %c0_14 = arith.constant 0 : index
    %c0_15 = arith.constant 0 : index
    %c0_16 = arith.constant 0 : index
    %29 = vector.load %arg7[%c0_14, %c0_15, %c0_16] : memref<1x128x256xbf16, #tpu.memory_space<vmem>>, vector<1x128x128xbf16>
    %30 = vector.shape_cast %29 : vector<1x128x128xbf16> to vector<128x128xbf16>
    %31 = vector.shape_cast %28 : vector<128x128xbf16> to vector<1x128x128xbf16>
    tpu.vector_store %arg7[%c0_14, %c0_15, %c0_16], %31 {strides = array<i32>} : memref<1x128x256xbf16, #tpu.memory_space<vmem>>, vector<1x128x128xbf16>,
    %32 = vector.extract_strided_slice %4 {offsets = [0, 384], sizes = [128, 128], strides = [1, 1]} : vector<128x512xf32> to vector<128x128xf32>
    %33 = arith.truncf %32 : vector<128x128xf32> to vector<128x128xbf16>
    %c0_17 = arith.constant 0 : index
    %c0_18 = arith.constant 0 : index
    %c128 = arith.constant 128 : index
    %34 = vector.load %arg7[%c0_17, %c0_18, %c128] : memref<1x128x256xbf16, #tpu.memory_space<vmem>>, vector<1x128x128xbf16>
    %35 = vector.shape_cast %34 : vector<1x128x128xbf16> to vector<128x128xbf16>
    %36 = vector.shape_cast %33 : vector<128x128xbf16> to vector<1x128x128xbf16>
    tpu.vector_store %arg7[%c0_17, %c0_18, %c128], %36 {strides = array<i32>} : memref<1x128x256xbf16, #tpu.memory_space<vmem>>, vector<1x128x128xbf16>,
    return
  }
  func.func @transform_0(%arg0: i32, %arg1: i32) -> (i32, i32) {
    %c0_i32 = arith.constant 0 : i32
    %c0_i32_0 = arith.constant 0 : i32
    return %arg1, %c0_i32 : i32, i32
  }
  func.func @transform_1(%arg0: i32, %arg1: i32) -> (i32, i32) {
    %c0_i32 = arith.constant 0 : i32
    %c0_i32_0 = arith.constant 0 : i32
    return %c0_i32, %arg0 : i32, i32
  }
  func.func @transform_2(%arg0: i32, %arg1: i32) -> (i32, i32) {
    %c0_i32 = arith.constant 0 : i32
    %c0_i32_0 = arith.constant 0 : i32
    return %arg1, %c0_i32 : i32, i32
  }
  func.func @transform_3(%arg0: i32, %arg1: i32) -> (i32, i32) {
    %c0_i32 = arith.constant 0 : i32
    %c0_i32_0 = arith.constant 0 : i32
    return %arg1, %c0_i32 : i32, i32
  }
  func.func @transform_4(%arg0: i32, %arg1: i32) -> (i32, i32, i32) {
    %c0_i32 = arith.constant 0 : i32
    %c0_i32_0 = arith.constant 0 : i32
    return %arg0, %arg1, %c0_i32 : i32, i32, i32
  }
  func.func @transform_5(%arg0: i32, %arg1: i32) -> (i32, i32, i32) {
    %c0_i32 = arith.constant 0 : i32
    %c0_i32_0 = arith.constant 0 : i32
    return %arg0, %arg1, %c0_i32 : i32, i32, i32
  }
}

</mosaic_0001>

<bundles_post_ra>
// kernel: tpu_custom_call.1
= control target key start
LH: loop header
LB: loop body
LE: loop exit
PB: predicated region body
PF: predicated region fallthrough
CT: control target
= control target key end

     0   :  { %s4051_s0 = inlined_call_operand.hbm [shape: bf16[256,256], index: 0, kind: input, shape index: {}]   ;;  %s4052_s1 = inlined_call_operand.hbm [shape: bf16[256,1024], index: 1, kind: input, shape index: {}]   ;;  %s4053_s2 = inlined_call_operand.hbm [shape: f32[256,128], index: 2, kind: input, shape index: {}]   ;;  %s4054_s3 = inlined_call_operand.hbm [shape: f32[256,128], index: 3, kind: input, shape index: {}]   ;;  %s4055_s4 = inlined_call_operand.hbm [shape: bf16[4,256,128], index: 4, kind: output, shape index: {0}]   ;;  %s4056_s5 = inlined_call_operand.hbm [shape: bf16[2,256,256], index: 5, kind: output, shape index: {1}]  }
   0x1   :  { %4075 = sst [smem:[#allocation40_spill]] %s4051_s0 }
   0x2   :  { %4076 = sst [smem:[#allocation41_spill]] %s4052_s1 }
   0x3   :  { %4077 = sst [smem:[#allocation42_spill]] %s4055_s4 }
   0x4   :  { %4078 = sst [smem:[#allocation43_spill]] %s4056_s5 }
   0x5   :  { %11 = vsyncpa [#allocation3], 0 }
   0x6   :  { %13 = vsyncpa [#allocation3 + $0x1], 0 }
   0x7   :  { %14 = vsyncpa [#allocation6], 0 }
   0x8   :  { %16 = vsyncpa [#allocation6 + $0x1], 0 }
   0x9   :  { %17 = vsyncpa [#allocation9], 0 }
   0xa   :  { %19 = vsyncpa [#allocation9 + $0x1], 0 }
   0xb   :  { %20 = vsyncpa [#allocation4], 0 }
   0xc   :  { %22 = vsyncpa [#allocation4 + $0x1], 0 }
   0xd   :  { %23 = vsyncpa [#allocation12], 0 }
   0xe   :  { %25 = vsyncpa [#allocation12 + $0x1], 0  ;;  %s2982_s18 = smov 0   ;;  %s2984_s19 = smov 0  }
   0xf   :  { %s2986_s20 = smov 0   ;;  %s2988_s21 = smov 0  }
  0x10   :  { %s2990_s22 = smov 0   ;;  %s2992_s23 = smov 0  }
  0x11   :  { %s2994_s24 = smov 0   ;;  %s2996_s25 = smov 0  }
  0x12   :  { %s2998_s26 = smov 0   ;;  %s3000_s27 = smov 0  }
  0x13   :  { %s3002_s28 = smov 0   ;;  %s3004_s29 = smov 0  }
  0x14   :  { %s3006_s30 = smov 0   ;;  %s3008_s6 = smov 0  }
  0x15 LB: > { %4079 = sst [smem:[#allocation21_spill]] %s2883_s18  ;;  %s3051_s7 = sadd.s32 4294967295, %s2935_s6   ;;  %s2935_s6 = sphi %s3008_s6, %s31_s6   ;;  %s2931_s30 = sphi %s3006_s30, %s4131_s30   ;;  %s2927_s29 = sphi %s3004_s29, %s4130_s29   ;;  %s2923_s28 = sphi %s3002_s28, %s4129_s28   ;;  %s2919_s27 = sphi %s3000_s27, %s4128_s27   ;;  %s2915_s26 = sphi %s2998_s26, %s4127_s26   ;;  %s2911_s25 = sphi %s2996_s25, %s4137_s25   ;;  %s2907_s24 = sphi %s2994_s24, %s4136_s24   ;;  %s2903_s23 = sphi %s2992_s23, %s4125_s23   ;;  %s2899_s22 = sphi %s2990_s22, %s4135_s22   ;;  %s2895_s21 = sphi %s2988_s21, %s4134_s21   ;;  %s2891_s20 = sphi %s2986_s20, %s4123_s20   ;;  %s2887_s19 = sphi %s2984_s19, %s4133_s19   ;;  %s2883_s18 = sphi %s2982_s18, %s4132_s18  }
  0x16   : > { %4080 = sst [smem:[#allocation22_spill]] %s2891_s20  ;;  %p58_p0 = scmp.eq.s32.totalorder %s2935_s6, 0 }
  0x17   : > { %4081 = sst [smem:[#allocation23_spill]] %s2903_s23  ;;  %p64_p1 = scmp.eq.s32.totalorder %s3051_s7, 0 }
  0x18   : > { %4082 = sst [smem:[#allocation24_spill]] %s2915_s26  ;;  %p83_p2 = scmp.ne.s32.totalorder %s2903_s23, %s2899_s22 }
  0x19   : > { %4083 = sst [smem:[#allocation25_spill]] %s2919_s27  ;;  %p89_p3 = scmp.ne.s32.totalorder %s2899_s22, %s2895_s21 }
  0x1a   : > { %4084 = sst [smem:[#allocation26_spill]] %s2923_s28  ;;  %p167_p4 = scmp.eq.s32.totalorder %s3051_s7, 3 }
  0x1b   : > { %4085 = sst [smem:[#allocation27_spill]] %s2927_s29  ;;  %p3063_p5 = por %p83_p2, %p58_p0 }
  0x1c   : > { %4086 = sst [smem:[#allocation28_spill]] %s2931_s30  ;;  %p3069_p6 = por %p89_p3, %p64_p1 }
  0x1d   : > { %4087 = sst [smem:[#allocation29_spill]] %s2935_s6  ;;  %p2524_p7 = scmp.lt.s32.totalorder %s2935_s6, 4 }
  0x1e   : > { %s244_s12 = sand.u32 1, %s2935_s6   ;;  %s246_s13 = sand.u32 1, %s2903_s23  }
  0x1f   : > { %s1940_s14 = sshll.u32 %s246_s13, 9  ;;  %s2306_s15 = sshll.u32 %s2931_s30, 4 }
  0x20   : > { %s4090_s1 = sld [smem:[#allocation41_spill]]  ;;  %s248_s9 = scalar_lea.vmem [#allocation5], %s1940_s14 }
  0x21   : > { %s256_s8 = sshll.u32 %s248_s9, 4  ;;  %p2508_p8 = pnand %p2524_p7, %p3063_p5  ;;  %s257_s8 = int_to_ptr.vmem [resolvable:$true] %s256_s8 }
  0x22   : > { %s3084_s13 = scalar_lea.sflag [#allocation6], %s244_s12  ;;  %s2938_s14 = smov 256  }
  0x23   : > { %s2939_s9 = smov 16   ;;  %p1949_p9 = scmp.ge.s32.totalorder %s2935_s6, 1 }
  0x24   : > { %p308_p10 = scmp.lt.s32.totalorder %s2935_s6, 5  ;;  %s1933_s12 = sadd.s32 4294967294, %s2935_s6  }
  0x25   : > { %s40_s16 = sadd.s32 1, %s2927_s29  ;;  %s50_s17 = sadd.s32 1, %s2915_s26 }
  0x26   : > { %s253_s21 = scalar_lea.hbm %s4090_s1, %s2306_s15  ;;  %s2937_s15 = smov 512  }
  0x27   : > { %s254_s5 = sshll.u32 %s253_s21, 4  ;;  %p3089_p11 = pnand %p1949_p9, %p308_p10  ;;  %s255_s5 = int_to_ptr.hbm [resolvable:$true] %s254_s5 }
  0x28   : > { %2510 = dma.hbm_to_vmem [thread:$0]  (!%p2508_p8), %s255_s5, 8192, %s257_s8, %s3084_s13, %s2937_s15, %s2938_s14, %s2939_s9  }
  0x29   : > { %p41_p12 = scmp.ge.s32.totalorder %s40_s16, 2  ;;  %p57_p13 = scmp.ne.s32.totalorder %s2915_s26, %s2911_s25 }
  0x2a   : > { %p63_p2 = scmp.ne.s32.totalorder %s2911_s25, %s2907_s24  ;;  %s156_s21 = sadd.s32 1, %s2891_s20 }
  0x2b   : > { %s4139_s16 = smov (%p41_p12, %s40_s16), 0  ;;  %s4093_s5 = sadd.s32 1, %s2931_s30 }
  0x2c   : > { %4092 = sst [smem:[#allocation30_spill]] %s4139_s16  ;;  %s4141_s5 = smov (!%p41_p12, %s4093_s5), %s2931_s30 }
  0x2d   : > { %s47_s8 = ssub.s32 %s2927_s29, %s4139_s16  ;;  %p3110_p3 = por %p58_p0, %p57_p13 }
  0x2e   : > { %p45_p5 = scmp.ge.s32.totalorder %s4141_s5, 2  ;;  %p48_p8 = scmp.eq.s32.totalorder %s47_s8, 0 }
  0x2f   : > { %p3116_p9 = por %p64_p1, %p63_p2  ;;  %p166_p10 = scmp.ne.s32.totalorder %s2891_s20, %s2887_s19 }
  0x30   : > { %s4143_s5 = smov (%p45_p5, %s4141_s5), 0  ;;  %p172_p13 = scmp.ne.s32.totalorder %s2887_s19, %s2883_s18 }
  0x31   : > { %4096 = sst [smem:[#allocation31_spill]] %s4143_s5  ;;  %s73_s9 = ssub.s32 %s2931_s30, %s4143_s5 }
  0x32   : > { %s3125_s14 = scalar_select %p48_p8, %s2915_s26, %s50_s17  }
  0x33   : > { %p3131_p0 = por %p167_p4, %p166_p10  ;;  %p74_p12 = scmp.eq.s32.totalorder %s73_s9, 0 }
  0x34   : > { %4097 = sst [smem:[#allocation32_spill]] %s3125_s14  ;;  %s153_s16 = sor.u32 %s73_s9, %s47_s8 }
  0x35   : > { %s4098_s1 = scalar_select %p3131_p0, 1, 0 }
  0x36   : > { %p154_p1 = scmp.eq.s32.totalorder %s153_s16, 0  ;;  %s4100_s4 = sadd.s32 1, %s2903_s23 }
  0x37   : > { %4099 = sst [smem:[#allocation33_spill]] %s4098_s1  ;;  %p173_p2 = scmp.eq.s32.totalorder %s1933_s12, 3 }
  0x38   : > { %s3140_s28 = scalar_select %p74_p12, %s2903_s23, %s4100_s4  }
  0x39   : > { %s3143_s27 = scalar_select %p154_p1, %s2891_s20, %s156_s21  }
  0x3a   : > { %4101 = sst [smem:[#allocation34_spill]] %s3140_s28  ;;  %s3146_s17 = sand.u32 1, %s2915_s26  }
  0x3b   : > { %4102 = sst [smem:[#allocation35_spill]] %s3143_s27  ;;  %s1936_s5 = sshll.u32 %s3146_s17, 7 }
  0x3c   : > { %p3149_p4 = por %p173_p2, %p172_p13  ;;  %s2305_s14 = sshll.u32 %s2927_s29, 7 }
  0x3d   : > { %s225_s1 = scalar_lea.vmem [#allocation2], %s1936_s5  ;;  %s4105_s0 = sld [smem:[#allocation40_spill]] }
  0x3e   : > { %s4103_s30 = scalar_select %p3149_p4, 1, 0 }
  0x3f   : > { %s234_s8 = sshll.u32 %s225_s1, 4  ;;  %p3161_p5 = pnand %p2524_p7, %p3110_p3  ;;  %s235_s8 = int_to_ptr.vmem [resolvable:$true] %s234_s8 }
  0x40   : > { %4104 = sst [smem:[#allocation36_spill]] %s4103_s30  ;;  %s222_s26 = scalar_lea.sflag [#allocation3], %s3146_s17 }
  0x41   : > { %s2940_s29 = smov 128   ;;  %s2941_s1 = smov 8  }
  0x42   : > { %s297_s20 = scalar_lea.hbm %s4054_s3, %s2305_s14  ;;  %s292_s30 = scalar_lea.vmem [#allocation8], %s1936_s5 }
  0x43   : > { %s231_s4 = scalar_lea.hbm %s4105_s0, %s2305_s14  ;;  %s270_s0 = scalar_lea.vmem [#allocation7], %s1936_s5 }
  0x44   : > { %s232_s21 = sshll.u32 %s231_s4, 4  ;;  %s275_s4 = scalar_lea.hbm %s4053_s2, %s2305_s14  ;;  %s233_s21 = int_to_ptr.hbm [resolvable:$true] %s232_s21 }
  0x45   : > { %2507 = dma.hbm_to_vmem [thread:$0]  (!%p3161_p5), %s233_s21, 2048, %s235_s8, %s222_s26, %s2940_s29, %s2940_s29, %s2941_s1  }
  0x46   : > { %s276_s15 = sshll.u32 %s275_s4, 4  ;;  %s278_s28 = sshll.u32 %s270_s0, 4  ;;  %s277_s15 = int_to_ptr.hbm [resolvable:$true] %s276_s15  ;;  %s279_s28 = int_to_ptr.vmem [resolvable:$true] %s278_s28 }
  0x47   : > { %2513 = dma.hbm_to_vmem [thread:$0]  (!%p3161_p5), %s277_s15, 2048, %s279_s28, %s3084_s13, %s2940_s29, %s2940_s29, %s2941_s1  }
  0x48   : > { %s300_s18 = sshll.u32 %s292_s30, 4  ;;  %s298_s6 = sshll.u32 %s297_s20, 4  ;;  %s301_s18 = int_to_ptr.vmem [resolvable:$true] %s300_s18  ;;  %s299_s6 = int_to_ptr.hbm [resolvable:$true] %s298_s6 }
  0x49   : > { %s289_s26 = scalar_lea.sflag [#allocation9], %s3146_s17  ;;  %312 = sbr.rel (%p3089_p11) target bundleno = 651 (0x28b), region = 36 }
  0x4a   : > { %2516 = dma.hbm_to_vmem [thread:$0]  (!%p3161_p5), %s299_s6, 2048, %s301_s18, %s289_s26, %s2940_s29, %s2940_s29, %s2941_s1  }
  0x4e   : > { %s314_s0 = sand.u32 1, %s2911_s25  }
  0x4f   : > { %s1950_s8 = sshll.u32 %s314_s0, 7  ;;  %s315_s28 = scalar_lea.sflag [#allocation3], %s314_s0 }
  0x50   : > { %s3183_s13 = scalar_lea.vmem [#allocation2], %s1950_s8 }
  0x51   : > { %2858 = dma.done.wait (%p3116_p9), %s315_s28, 2048  }
  0x52   : > { %2860 = vsyncadd (%p3116_p9), %s315_s28, 4294965248  ;;  %s324_s20 = sand.u32 1, %s3051_s7   ;;  %s326_s18 = sand.u32 1, %s2899_s22  }
  0x53   : > { %s1951_s23 = sshll.u32 %s326_s18, 9  ;;  %s325_s27 = scalar_lea.sflag [#allocation6], %s324_s20 }
  0x54   : > { %s3191_s29 = scalar_lea.vmem [#allocation5], %s1951_s23 }
  0x55   : > { %2862 = dma.done.wait (%p3069_p6), %s325_s27, 8192  }
  0x56   : > { %2864 = vsyncadd (%p3069_p6), %s325_s27, 4294959104  ;;  %s3197_s30 = scalar_lea.vmem [#allocation7], %s1950_s8 }
  0x57   : > { %2866 = dma.done.wait (%p3116_p9), %s325_s27, 2048  }
  0x58   : > { %2868 = vsyncadd (%p3116_p9), %s325_s27, 4294965248  ;;  %s345_s6 = scalar_lea.sflag [#allocation9], %s314_s0  ;;  %s3203_s7 = scalar_lea.vmem [#allocation8], %s1950_s8 }
  0x59   : > { %2870 = dma.done.wait (%p3116_p9), %s345_s6, 2048  }
  0x5a   : > { %2872 = vsyncadd (%p3116_p9), %s345_s6, 4294965248  ;;  %v2134_v0 = vld [vmem:[%s3191_s29 + $0xe0] sm:$0xf]  ;;  %v2355_v1 = vld [vmem:[%s3191_s29 + $0xec] sm:$0xf0]  ;;  %s3418_s11 = sand.u32 1, %s2887_s19  }
  0x5b   : > { %v2262_v2 = vld [vmem:[%s3191_s29 + $0x1e0] sm:$0xf]  ;;  %v2135_v3 = vor.u32 %v2355_v1, %v2134_v0  ;;  %v2387_v4 = vld [vmem:[%s3191_s29 + $0x1ec] sm:$0xf0]  ;;  %v2353_v5 = vld [vmem:[%s3191_s29 + $0xe4] sm:$0xf] }
  0x5c   : > { %v2136_v6 = vld [vmem:[%s3191_s29 + $0xf0] sm:$0xf0]  ;;  %v2263_v7 = vor.u32 %v2387_v4, %v2262_v2  ;;  %v2385_v9 = vld [vmem:[%s3191_s29 + $0x1e4] sm:$0xf]  ;;  %v2118_v11 = vld [vmem:[%s3191_s29 + $0xc0] sm:$0xf] }
  0x5d   : > { %v2139_v8 = vor.u32 %v2353_v5, %v2136_v6  ;;  %v2264_v10 = vld [vmem:[%s3191_s29 + $0x1f0] sm:$0xf0]  ;;  %915 = vmatpush.bf16.msra.mxu0 %v2135_v3  ;;  %v2351_v13 = vld [vmem:[%s3191_s29 + $0xcc] sm:$0xf0]  ;;  %v2246_v14 = vld [vmem:[%s3191_s29 + $0x1c0] sm:$0xf] }
  0x5e   : > { %v2267_v12 = vor.u32 %v2385_v9, %v2264_v10  ;;  %v2383_v15 = vld [vmem:[%s3191_s29 + $0x1cc] sm:$0xf0]  ;;  %964 = vmatpush.bf16.msra.mxu1 %v2263_v7  ;;  %v2119_v16 = vor.u32 %v2351_v13, %v2118_v11  ;;  %v2349_v18 = vld [vmem:[%s3191_s29 + $0xc4] sm:$0xf]  ;;  %v2120_v19 = vld [vmem:[%s3191_s29 + $0xd0] sm:$0xf0] }
  0x5f   : > { %1013 = vmatpush.bf16.msra.mxu2 %v2139_v8  ;;  %v2247_v17 = vor.u32 %v2383_v15, %v2246_v14  ;;  %v2381_v20 = vld [vmem:[%s3191_s29 + $0x1c4] sm:$0xf]  ;;  %v2123_v21 = vor.u32 %v2349_v18, %v2120_v19  ;;  %v2248_v22 = vld [vmem:[%s3191_s29 + $0x1d0] sm:$0xf0]  ;;  %v2102_v23 = vld [vmem:[%s3191_s29 + $0xa0] sm:$0xf] }
  0x60   : > { %1062 = vmatpush.bf16.msra.mxu3 %v2267_v12  ;;  %v2347_v24 = vld [vmem:[%s3191_s29 + $0xac] sm:$0xf0]  ;;  %v2251_v25 = vor.u32 %v2381_v20, %v2248_v22  ;;  %v2230_v26 = vld [vmem:[%s3191_s29 + $0x1a0] sm:$0xf]  ;;  %v2345_v28 = vld [vmem:[%s3191_s29 + $0xa4] sm:$0xf] }
  0x61   : > { %v2379_v27 = vld [vmem:[%s3191_s29 + $0x1ac] sm:$0xf0]  ;;  %916 = vmatpush.bf16.msra.mxu0 %v2119_v16  ;;  %v2103_v29 = vor.u32 %v2347_v24, %v2102_v23  ;;  %v2104_v30 = vld [vmem:[%s3191_s29 + $0xb0] sm:$0xf0]  ;;  %v2377_v31 = vld [vmem:[%s3191_s29 + $0x1a4] sm:$0xf] }
  0x62   : > { %v2232_v32 = vld [vmem:[%s3191_s29 + $0x1b0] sm:$0xf0]  ;;  %965 = vmatpush.bf16.msra.mxu1 %v2247_v17  ;;  %v2231_v33 = vor.u32 %v2379_v27, %v2230_v26  ;;  %v2107_v34 = vor.u32 %v2345_v28, %v2104_v30  ;;  %v2086_v35 = vld [vmem:[%s3191_s29 + $0x80] sm:$0xf]  ;;  %v2343_v36 = vld [vmem:[%s3191_s29 + $0x8c] sm:$0xf0] }
  0x63   : > { %1014 = vmatpush.bf16.msra.mxu2 %v2123_v21  ;;  %v2214_v37 = vld [vmem:[%s3191_s29 + $0x180] sm:$0xf]  ;;  %v2235_v38 = vor.u32 %v2377_v31, %v2232_v32  ;;  %v2375_v39 = vld [vmem:[%s3191_s29 + $0x18c] sm:$0xf0]  ;;  %v2341_v40 = vld [vmem:[%s3191_s29 + $0x84] sm:$0xf]  ;;  %v2087_v44 = vor.u32 %v2343_v36, %v2086_v35 }
  0x64   : > { %1063 = vmatpush.bf16.msra.mxu3 %v2251_v25  ;;  %v2088_v41 = vld [vmem:[%s3191_s29 + $0x90] sm:$0xf0]  ;;  %v2373_v42 = vld [vmem:[%s3191_s29 + $0x184] sm:$0xf]  ;;  %v2215_v45 = vor.u32 %v2375_v39, %v2214_v37  ;;  %v2070_v47 = vld [vmem:[%s3191_s29 + $0x60] sm:$0xf] }
  0x65   : > { %v2216_v43 = vld [vmem:[%s3191_s29 + $0x190] sm:$0xf0]  ;;  %917 = vmatpush.bf16.msra.mxu0 %v2103_v29  ;;  %v2091_v46 = vor.u32 %v2341_v40, %v2088_v41  ;;  %v2339_v48 = vld [vmem:[%s3191_s29 + $0x6c] sm:$0xf0]  ;;  %v2198_v49 = vld [vmem:[%s3191_s29 + $0x160] sm:$0xf] }
  0x66   : > { %966 = vmatpush.bf16.msra.mxu1 %v2231_v33  ;;  %v2219_v50 = vor.u32 %v2373_v42, %v2216_v43  ;;  %v2371_v51 = vld [vmem:[%s3191_s29 + $0x16c] sm:$0xf0]  ;;  %v2337_v52 = vld [vmem:[%s3191_s29 + $0x64] sm:$0xf]  ;;  %v2072_v53 = vld [vmem:[%s3191_s29 + $0x70] sm:$0xf0]  ;;  %v2071_v56 = vor.u32 %v2339_v48, %v2070_v47 }
  0x67   : > { %1015 = vmatpush.bf16.msra.mxu2 %v2107_v34  ;;  %v2369_v54 = vld [vmem:[%s3191_s29 + $0x164] sm:$0xf]  ;;  %v2200_v55 = vld [vmem:[%s3191_s29 + $0x170] sm:$0xf0]  ;;  %v2199_v57 = vor.u32 %v2371_v51, %v2198_v49  ;;  %v2075_v58 = vor.u32 %v2337_v52, %v2072_v53  ;;  %v2054_v59 = vld [vmem:[%s3191_s29 + $0x40] sm:$0xf] }
  0x68   : > { %1064 = vmatpush.bf16.msra.mxu3 %v2235_v38  ;;  %v2335_v60 = vld [vmem:[%s3191_s29 + $0x4c] sm:$0xf0]  ;;  %v2182_v61 = vld [vmem:[%s3191_s29 + $0x140] sm:$0xf]  ;;  %v2203_v62 = vor.u32 %v2369_v54, %v2200_v55  ;;  %v2333_v0 = vld [vmem:[%s3191_s29 + $0x44] sm:$0xf] }
  0x69   : > { %918 = vmatpush.bf16.msra.mxu0 %v2087_v44  ;;  %v2367_v63 = vld [vmem:[%s3191_s29 + $0x14c] sm:$0xf0]  ;;  %v2056_v1 = vld [vmem:[%s3191_s29 + $0x50] sm:$0xf0]  ;;  %v2365_v2 = vld [vmem:[%s3191_s29 + $0x144] sm:$0xf]  ;;  %v2055_v4 = vor.u32 %v2335_v60, %v2054_v59 }
  0x6a   : > { %967 = vmatpush.bf16.msra.mxu1 %v2215_v45  ;;  %v2184_v3 = vld [vmem:[%s3191_s29 + $0x150] sm:$0xf0]  ;;  %v2183_v5 = vor.u32 %v2367_v63, %v2182_v61  ;;  %v2059_v6 = vor.u32 %v2333_v0, %v2056_v1  ;;  %v2038_v7 = vld [vmem:[%s3191_s29 + $0x20] sm:$0xf]  ;;  %v2331_v8 = vld [vmem:[%s3191_s29 + $0x2c] sm:$0xf0] }
  0x6b   : > { %1016 = vmatpush.bf16.msra.mxu2 %v2091_v46  ;;  %v2166_v9 = vld [vmem:[%s3191_s29 + $0x120] sm:$0xf]  ;;  %v2187_v10 = vor.u32 %v2365_v2, %v2184_v3  ;;  %v2363_v11 = vld [vmem:[%s3191_s29 + $0x12c] sm:$0xf0]  ;;  %v2329_v12 = vld [vmem:[%s3191_s29 + $0x24] sm:$0xf]  ;;  %v2039_v16 = vor.u32 %v2331_v8, %v2038_v7 }
  0x6c   : > { %1065 = vmatpush.bf16.msra.mxu3 %v2219_v50  ;;  %v2040_v13 = vld [vmem:[%s3191_s29 + $0x30] sm:$0xf0]  ;;  %v2361_v14 = vld [vmem:[%s3191_s29 + $0x124] sm:$0xf]  ;;  %v2022_v17 = vld [vmem:[%s3191_s29] sm:$0xf]  ;;  %v2167_v19 = vor.u32 %v2363_v11, %v2166_v9 }
  0x6d   : > { %919 = vmatpush.bf16.msra.mxu0 %v2071_v56  ;;  %v2168_v15 = vld [vmem:[%s3191_s29 + $0x130] sm:$0xf0]  ;;  %v2327_v18 = vld [vmem:[%s3191_s29 + $0xc] sm:$0xf0]  ;;  %v2043_v20 = vor.u32 %v2329_v12, %v2040_v13  ;;  %v2150_v21 = vld [vmem:[%s3191_s29 + $0x100] sm:$0xf] }
  0x6e   : > { %968 = vmatpush.bf16.msra.mxu1 %v2199_v57  ;;  %v2359_v22 = vld [vmem:[%s3191_s29 + $0x10c] sm:$0xf0]  ;;  %v2325_v23 = vld [vmem:[%s3191_s29 + $0x4] sm:$0xf]  ;;  %v2171_v24 = vor.u32 %v2361_v14, %v2168_v15  ;;  %v2024_v25 = vld [vmem:[%s3191_s29 + $0x10] sm:$0xf0]  ;;  %v2023_v31 = vor.u32 %v2327_v18, %v2022_v17 }
  0x6f   : > { %1017 = vmatpush.bf16.msra.mxu2 %v2075_v58  ;;  %v2357_v26 = vld [vmem:[%s3191_s29 + $0x104] sm:$0xf]  ;;  %v2152_v27 = vld [vmem:[%s3191_s29 + $0x110] sm:$0xf0]  ;;  %v1958_v28 = vld [vmem:[%s3183_s13] sm:$0xf]  ;;  %v2151_v35 = vor.u32 %v2359_v22, %v2150_v21  ;;  %v2027_v36 = vor.u32 %v2325_v23, %v2024_v25 }
  0x70   : > { %1066 = vmatpush.bf16.msra.mxu3 %v2203_v62  ;;  %v2142_v29 = vld [vmem:[%s3191_s29 + $0xe8] sm:$0xf]  ;;  %v2356_v30 = vld [vmem:[%s3191_s29 + $0xf4] sm:$0xf0]  ;;  %v2309_v37 = vld [vmem:[%s3183_s13 + $0x4] sm:$0xf]  ;;  %v2155_v39 = vor.u32 %v2357_v26, %v2152_v27 }
  0x71   : > { %920 = vmatpush.bf16.msra.mxu0 %v2055_v4  ;;  %v2310_v32 = vld [vmem:[%s3183_s13 + $0x4] sm:$0xf0]  ;;  %v2388_v34 = vld [vmem:[%s3191_s29 + $0x1f4] sm:$0xf0]  ;;  %v1960_v38 = vld [vmem:[%s3183_s13 + $0x8] sm:$0xf0]  ;;  %v2143_v40 = vor.u32 %v2356_v30, %v2142_v29 }
  0x72   : > { %969 = vmatpush.bf16.msra.mxu1 %v2183_v5  ;;  %v2270_v33 = vld [vmem:[%s3191_s29 + $0x1e8] sm:$0xf]  ;;  %v3281_v41 = vor.u32 %v2310_v32, %v1958_v28  ;;  %v2352_v44 = vld [vmem:[%s3191_s29 + $0xd4] sm:$0xf0]  ;;  %v3285_v45 = vor.u32 %v2309_v37, %v1960_v38  ;;  %v1966_v56 = vld [vmem:[%s3183_s13 + $0x10] sm:$0xf] }
  0x73   : > { %1018 = vmatpush.bf16.msra.mxu2 %v2059_v6  ;;  %v2271_v42 = vor.u32 %v2388_v34, %v2270_v33  ;;  %v2126_v43 = vld [vmem:[%s3191_s29 + $0xc8] sm:$0xf]  ;;  %v2384_v47 = vld [vmem:[%s3191_s29 + $0x1d4] sm:$0xf0]  ;;  %v2311_v58 = vld [vmem:[%s3183_s13 + $0x14] sm:$0xf] }
  0x74   : > { %1067 = vmatpush.bf16.msra.mxu3 %v2187_v10  ;;  %v2254_v46 = vld [vmem:[%s3191_s29 + $0x1c8] sm:$0xf]  ;;  %v2127_v48 = vor.u32 %v2352_v44, %v2126_v43  ;;  %v2348_v51 = vld [vmem:[%s3191_s29 + $0xb4] sm:$0xf0]  ;;  %v1968_v59 = vld [vmem:[%s3183_s13 + $0x18] sm:$0xf0] }
  0x75   : > { %921 = vmatpush.bf16.msra.mxu0 %v2039_v16  ;;  %v2255_v49 = vor.u32 %v2384_v47, %v2254_v46  ;;  %v2110_v50 = vld [vmem:[%s3191_s29 + $0xa8] sm:$0xf]  ;;  %v2380_v54 = vld [vmem:[%s3191_s29 + $0x1b4] sm:$0xf0]  ;;  %v3303_v61 = vor.u32 %v2311_v58, %v1968_v59  ;;  %v1974_v4 = vld [vmem:[%s3183_s13 + $0x20] sm:$0xf] }
  0x76   : > { %970 = vmatpush.bf16.msra.mxu1 %v2167_v19  ;;  %v2238_v52 = vld [vmem:[%s3191_s29 + $0x1a8] sm:$0xf]  ;;  %v2111_v53 = vor.u32 %v2348_v51, %v2110_v50  ;;  %v2312_v57 = vld [vmem:[%s3183_s13 + $0x14] sm:$0xf0]  ;;  %v2313_v6 = vld [vmem:[%s3183_s13 + $0x24] sm:$0xf] }
  0x77   : > { %1019 = vmatpush.bf16.msra.mxu2 %v2043_v20  ;;  %v2239_v55 = vor.u32 %v2380_v54, %v2238_v52  ;;  %v3301_v60 = vor.u32 %v2312_v57, %v1966_v56  ;;  %v2094_v62 = vld [vmem:[%s3191_s29 + $0x88] sm:$0xf]  ;;  %v2344_v63 = vld [vmem:[%s3191_s29 + $0x94] sm:$0xf0]  ;;  %v1976_v7 = vld [vmem:[%s3183_s13 + $0x28] sm:$0xf0] }
  0x78   : > { %1068 = vmatpush.bf16.msra.mxu3 %v2171_v24  ;;  %v2222_v0 = vld [vmem:[%s3191_s29 + $0x188] sm:$0xf]  ;;  %v2095_v1 = vor.u32 %v2344_v63, %v2094_v62  ;;  %v2376_v2 = vld [vmem:[%s3191_s29 + $0x194] sm:$0xf0]  ;;  %v3319_v9 = vor.u32 %v2313_v6, %v1976_v7  ;;  %v1982_v16 = vld [vmem:[%s3183_s13 + $0x30] sm:$0xf] }
  0x79   : > { %922 = vmatpush.bf16.msra.mxu0 %v2023_v31  ;;  %v2223_v3 = vor.u32 %v2376_v2, %v2222_v0  ;;  %v2314_v5 = vld [vmem:[%s3183_s13 + $0x24] sm:$0xf0]  ;;  %v2340_v11 = vld [vmem:[%s3191_s29 + $0x74] sm:$0xf0]  ;;  %v2315_v18 = vld [vmem:[%s3183_s13 + $0x34] sm:$0xf] }
  0x7a   : > { %971 = vmatpush.bf16.msra.mxu1 %v2151_v35  ;;  %v3317_v8 = vor.u32 %v2314_v5, %v1974_v4  ;;  %v2078_v10 = vld [vmem:[%s3191_s29 + $0x68] sm:$0xf]  ;;  %v2372_v14 = vld [vmem:[%s3191_s29 + $0x174] sm:$0xf0]  ;;  %v1984_v19 = vld [vmem:[%s3183_s13 + $0x38] sm:$0xf0] }
  0x7b   : > { %1020 = vmatpush.bf16.msra.mxu2 %v2027_v36  ;;  %v2206_v12 = vld [vmem:[%s3191_s29 + $0x168] sm:$0xf]  ;;  %v2079_v13 = vor.u32 %v2340_v11, %v2078_v10  ;;  %v2316_v17 = vld [vmem:[%s3183_s13 + $0x34] sm:$0xf0]  ;;  %v3335_v21 = vor.u32 %v2315_v18, %v1984_v19  ;;  %v1990_v28 = vld [vmem:[%s3183_s13 + $0x40] sm:$0xf] }
  0x7c   : > { %1069 = vmatpush.bf16.msra.mxu3 %v2155_v39  ;;  %923 = vmatmul.bf16.vlgmr.msra.gmra.mxu0 %v3281_v41  ;;  %v2207_v15 = vor.u32 %v2372_v14, %v2206_v12  ;;  %v3333_v20 = vor.u32 %v2316_v17, %v1982_v16  ;;  %v2062_v22 = vld [vmem:[%s3191_s29 + $0x48] sm:$0xf]  ;;  %v2336_v23 = vld [vmem:[%s3191_s29 + $0x54] sm:$0xf0]  ;;  %v2317_v30 = vld [vmem:[%s3183_s13 + $0x44] sm:$0xf] }
  0x7d   : > { %1111 = vmatpush.bf16.msrb.mxu0 %v2143_v40  ;;  %972 = vmatmul.bf16.vlgmr.msra.gmra.mxu1 %v3285_v45  ;;  %v2190_v24 = vld [vmem:[%s3191_s29 + $0x148] sm:$0xf]  ;;  %v2063_v25 = vor.u32 %v2336_v23, %v2062_v22  ;;  %v2368_v26 = vld [vmem:[%s3191_s29 + $0x154] sm:$0xf0]  ;;  %v1992_v31 = vld [vmem:[%s3183_s13 + $0x48] sm:$0xf0] }
  0x7e   : > { %1160 = vmatpush.bf16.msrb.mxu1 %v2271_v42  ;;  %1021 = vmatmul.bf16.vlgmr.msra.gmra.mxu2 %v3281_v41  ;;  %v2191_v27 = vor.u32 %v2368_v26, %v2190_v24  ;;  %v2318_v29 = vld [vmem:[%s3183_s13 + $0x44] sm:$0xf0]  ;;  %v3351_v33 = vor.u32 %v2317_v30, %v1992_v31  ;;  %v2332_v35 = vld [vmem:[%s3191_s29 + $0x34] sm:$0xf0]  ;;  %v2354_v39 = vld [vmem:[%s3191_s29 + $0xec] sm:$0xf] }
  0x7f   : > { %1070 = vmatmul.bf16.vlgmr.msra.gmra.mxu3 %v3285_v45  ;;  %v3349_v32 = vor.u32 %v2318_v29, %v1990_v28  ;;  %v2046_v34 = vld [vmem:[%s3191_s29 + $0x28] sm:$0xf]  ;;  %v2364_v38 = vld [vmem:[%s3191_s29 + $0x134] sm:$0xf0]  ;;  %v2144_v40 = vld [vmem:[%s3191_s29 + $0xf8] sm:$0xf0] }
  0x80   : > { %v2174_v36 = vld [vmem:[%s3191_s29 + $0x128] sm:$0xf]  ;;  %v2047_v37 = vor.u32 %v2332_v35, %v2046_v34  ;;  %v2147_v43 = vor.u32 %v2354_v39, %v2144_v40  ;;  %v2386_v44 = vld [vmem:[%s3191_s29 + $0x1ec] sm:$0xf]  ;;  %v2272_v46 = vld [vmem:[%s3191_s29 + $0x1f8] sm:$0xf0] }
  0x81   : > { %1112 = vmatpush.bf16.msrb.mxu0 %v2127_v48  ;;  %v2175_v42 = vor.u32 %v2364_v38, %v2174_v36  ;;  %v2275_v47 = vor.u32 %v2386_v44, %v2272_v46  ;;  %v1998_v48 = vld [vmem:[%s3183_s13 + $0x50] sm:$0xf]  ;;  %v2319_v50 = vld [vmem:[%s3183_s13 + $0x54] sm:$0xf]  ;;  %v2000_v51 = vld [vmem:[%s3183_s13 + $0x58] sm:$0xf0] }
  0x82   : > { %1161 = vmatpush.bf16.msrb.mxu1 %v2255_v49  ;;  %1209 = vmatpush.bf16.msrb.mxu2 %v2147_v43  ;;  %v2320_v49 = vld [vmem:[%s3183_s13 + $0x54] sm:$0xf0]  ;;  %v2030_v54 = vld [vmem:[%s3191_s29 + $0x8] sm:$0xf]  ;;  %v2350_v59 = vld [vmem:[%s3191_s29 + $0xcc] sm:$0xf] }
  0x83   : > { %1258 = vmatpush.bf16.msrb.mxu3 %v2275_v47  ;;  %v3369_v52 = vor.u32 %v2320_v49, %v1998_v48  ;;  %v2158_v56 = vld [vmem:[%s3191_s29 + $0x108] sm:$0xf]  ;;  %v2360_v58 = vld [vmem:[%s3191_s29 + $0x114] sm:$0xf0]  ;;  %v2128_v62 = vld [vmem:[%s3191_s29 + $0xd8] sm:$0xf0] }
  0x84   : > { %v2159_v63 = vor.u32 %v2360_v58, %v2158_v56  ;;  %v2131_v0 = vor.u32 %v2350_v59, %v2128_v62  ;;  %v2256_v2 = vld [vmem:[%s3191_s29 + $0x1d8] sm:$0xf0]  ;;  %v2006_v4 = vld [vmem:[%s3183_s13 + $0x60] sm:$0xf]  ;;  %v2322_v5 = vld [vmem:[%s3183_s13 + $0x64] sm:$0xf0] }
  0x85   : > { %1113 = vmatpush.bf16.msrb.mxu0 %v2111_v53  ;;  %v3371_v53 = vor.u32 %v2319_v50, %v2000_v51  ;;  %v2321_v6 = vld [vmem:[%s3183_s13 + $0x64] sm:$0xf]  ;;  %v2008_v7 = vld [vmem:[%s3183_s13 + $0x68] sm:$0xf0]  ;;  %v3389_v10 = vor.u32 %v2322_v5, %v2006_v4  ;;  %v2014_v12 = vld [vmem:[%s3183_s13 + $0x70] sm:$0xf] }
  0x86   : > { %1162 = vmatpush.bf16.msrb.mxu1 %v2239_v55  ;;  %v2328_v55 = vld [vmem:[%s3191_s29 + $0x14] sm:$0xf0]  ;;  %1210 = vmatpush.bf16.msrb.mxu2 %v2131_v0  ;;  %v3391_v11 = vor.u32 %v2321_v6, %v2008_v7  ;;  %v2346_v14 = vld [vmem:[%s3191_s29 + $0xac] sm:$0xf]  ;;  %v2323_v17 = vld [vmem:[%s3183_s13 + $0x74] sm:$0xf] }
  0x87   : > { %v2031_v57 = vor.u32 %v2328_v55, %v2030_v54  ;;  %v2378_v16 = vld [vmem:[%s3191_s29 + $0x1ac] sm:$0xf]  ;;  %v2016_v18 = vld [vmem:[%s3183_s13 + $0x78] sm:$0xf0]  ;;  %s2942_s10 = smov 64   ;;  %s1954_s5 = sshll.u32 %s3418_s11, 7 }
  0x88   : > { %v2240_v22 = vld [vmem:[%s3191_s29 + $0x1b8] sm:$0xf0]  ;;  %v2342_v26 = vld [vmem:[%s3191_s29 + $0x8c] sm:$0xf]  ;;  %s3618_s24 = scalar_lea.vmem [#allocation10], %s1954_s5  ;;  %s3791_s14 = scalar_lea.vmem [#allocation11], %s1954_s5 }
  0x89   : > { %1114 = vmatpush.bf16.msrb.mxu0 %v2095_v1  ;;  %v2382_v1 = vld [vmem:[%s3191_s29 + $0x1cc] sm:$0xf]  ;;  %v2243_v23 = vor.u32 %v2378_v16, %v2240_v22  ;;  %v2224_v30 = vld [vmem:[%s3191_s29 + $0x198] sm:$0xf0]  ;;  %s1677_s17 = scalar_lea.sflag [#allocation4], %s3418_s11  ;;  %s1682_s21 = scalar_lea.sflag [#allocation12], %s3418_s11 }
  0x8a   : > { %1163 = vmatpush.bf16.msrb.mxu1 %v2223_v3  ;;  %v2259_v3 = vor.u32 %v2382_v1, %v2256_v2  ;;  %v2374_v28 = vld [vmem:[%s3191_s29 + $0x18c] sm:$0xf]  ;;  %v2080_v46 = vld [vmem:[%s3191_s29 + $0x78] sm:$0xf0] }
  0x8b   : > { %v2227_v31 = vor.u32 %v2374_v28, %v2224_v30  ;;  %v2338_v44 = vld [vmem:[%s3191_s29 + $0x6c] sm:$0xf]  ;;  %v2208_v49 = vld [vmem:[%s3191_s29 + $0x178] sm:$0xf0] }
  0x8c   : > { %928 = vmatmul.bf16.gmra.mxu0 %v3301_v60  ;;  %1259 = vmatpush.bf16.msrb.mxu3 %v2259_v3  ;;  %v2370_v47 = vld [vmem:[%s3191_s29 + $0x16c] sm:$0xf]  ;;  %v2083_v48 = vor.u32 %v2338_v44, %v2080_v46  ;;  %v2064_v4 = vld [vmem:[%s3191_s29 + $0x58] sm:$0xf0] }
  0x8d   : > { %977 = vmatmul.bf16.gmra.mxu1 %v3303_v61  ;;  %1115 = vmatpush.bf16.msrb.mxu0 %v2079_v13  ;;  %v2324_v13 = vld [vmem:[%s3183_s13 + $0x74] sm:$0xf0]  ;;  %v2211_v50 = vor.u32 %v2370_v47, %v2208_v49  ;;  %v2334_v3 = vld [vmem:[%s3191_s29 + $0x4c] sm:$0xf]  ;;  %v2192_v7 = vld [vmem:[%s3191_s29 + $0x158] sm:$0xf0] }
  0x8e   : > { %1026 = vmatmul.bf16.gmra.mxu2 %v3301_v60  ;;  %1164 = vmatpush.bf16.msrb.mxu1 %v2207_v15  ;;  %v2112_v15 = vld [vmem:[%s3191_s29 + $0xb8] sm:$0xf0]  ;;  %v3405_v24 = vor.u32 %v2324_v13, %v2014_v12  ;;  %v2366_v5 = vld [vmem:[%s3191_s29 + $0x14c] sm:$0xf]  ;;  %v2067_v6 = vor.u32 %v2334_v3, %v2064_v4 }
  0x8f   : > { %1075 = vmatmul.bf16.gmra.mxu3 %v3303_v61  ;;  %v2115_v19 = vor.u32 %v2346_v14, %v2112_v15  ;;  %v2195_v12 = vor.u32 %v2366_v5, %v2192_v7  ;;  %v2330_v28 = vld [vmem:[%s3191_s29 + $0x2c] sm:$0xf] }
  0x90   : > { %1260 = vmatpush.bf16.msrb.mxu3 %v2243_v23  ;;  %v2362_v30 = vld [vmem:[%s3191_s29 + $0x12c] sm:$0xf] }
  0x91   : > { %1116 = vmatpush.bf16.msrb.mxu0 %v2063_v25  ;;  %1211 = vmatpush.bf16.msrb.mxu2 %v2115_v19  ;;  %v3407_v25 = vor.u32 %v2323_v17, %v2016_v18 }
  0x92   : > { %1165 = vmatpush.bf16.msrb.mxu1 %v2191_v27  ;;  %v2096_v27 = vld [vmem:[%s3191_s29 + $0x98] sm:$0xf0] }
  0x93   : > { %v2099_v29 = vor.u32 %v2342_v26, %v2096_v27 }
  0x94   : > { %1261 = vmatpush.bf16.msrb.mxu3 %v2227_v31 }
  0x95   : > { %1117 = vmatpush.bf16.msrb.mxu0 %v2047_v37  ;;  %1212 = vmatpush.bf16.msrb.mxu2 %v2099_v29  ;;  %v2048_v29 = vld [vmem:[%s3191_s29 + $0x38] sm:$0xf0] }
  0x96   : > { %1166 = vmatpush.bf16.msrb.mxu1 %v2175_v42  ;;  %v2051_v31 = vor.u32 %v2330_v28, %v2048_v29 }
  0x98   : > { %1262 = vmatpush.bf16.msrb.mxu3 %v2211_v50 }
  0x99   : > { %1118 = vmatpush.bf16.msrb.mxu0 %v2031_v57  ;;  %1213 = vmatpush.bf16.msrb.mxu2 %v2083_v48 }
  0x9a   : > { %1167 = vmatpush.bf16.msrb.mxu1 %v2159_v63 }
  0x9c   : > { %933 = vmatmul.bf16.gmra.mxu0 %v3317_v8  ;;  %1263 = vmatpush.bf16.msrb.mxu3 %v2195_v12 }
  0x9d   : > { %982 = vmatmul.bf16.gmra.mxu1 %v3319_v9  ;;  %1214 = vmatpush.bf16.msrb.mxu2 %v2067_v6 }
  0x9e   : > { %1031 = vmatmul.bf16.gmra.mxu2 %v3317_v8 }
  0x9f   : > { %1080 = vmatmul.bf16.gmra.mxu3 %v3319_v9 }
  0xa1   : > { %1215 = vmatpush.bf16.msrb.mxu2 %v2051_v31 }
  0xac   : > { %938 = vmatmul.bf16.gmra.mxu0 %v3333_v20 }
  0xad   : > { %987 = vmatmul.bf16.gmra.mxu1 %v3335_v21 }
  0xae   : > { %1036 = vmatmul.bf16.gmra.mxu2 %v3333_v20 }
  0xaf   : > { %1085 = vmatmul.bf16.gmra.mxu3 %v3335_v21 }
  0xbc   : > { %943 = vmatmul.bf16.gmra.mxu0 %v3349_v32 }
  0xbd   : > { %992 = vmatmul.bf16.gmra.mxu1 %v3351_v33 }
  0xbe   : > { %1041 = vmatmul.bf16.gmra.mxu2 %v3349_v32 }
  0xbf   : > { %1090 = vmatmul.bf16.gmra.mxu3 %v3351_v33 }
  0xcc   : > { %948 = vmatmul.bf16.gmra.mxu0 %v3369_v52 }
  0xcd   : > { %997 = vmatmul.bf16.gmra.mxu1 %v3371_v53 }
  0xce   : > { %1046 = vmatmul.bf16.gmra.mxu2 %v3369_v52 }
  0xcf   : > { %1095 = vmatmul.bf16.gmra.mxu3 %v3371_v53 }
  0xdc   : > { %953 = vmatmul.bf16.gmra.mxu0 %v3389_v10 }
  0xdd   : > { %1002 = vmatmul.bf16.gmra.mxu1 %v3391_v11 }
  0xde   : > { %1051 = vmatmul.bf16.gmra.mxu2 %v3389_v10 }
  0xdf   : > { %1100 = vmatmul.bf16.gmra.mxu3 %v3391_v11 }
  0xec   : > { %958 = vmatmul.bf16.gmra.mxu0 %v3405_v24 }
  0xed   : > { %1007 = vmatmul.bf16.gmra.mxu1 %v3407_v25 }
  0xee   : > { %1056 = vmatmul.bf16.gmra.mxu2 %v3405_v24 }
  0xef   : > { %1105 = vmatmul.bf16.gmra.mxu3 %v3407_v25 }
  0xf9   : > { %v924_v34 = vpop.f32.mrf.mxu0 }
  0xfa   : > { %v973_v35 = vpop.f32.mrf.mxu1 }
  0xfb   : > { %v3420_v36 = vadd.f32 %v973_v35, %v924_v34  ;;  %v2176_v34 = vld [vmem:[%s3191_s29 + $0x138] sm:$0xf0] }
  0xfc   : > { %1119 = vmatmul.bf16.vlgmr.msrb.gmra.mxu0 %v3281_v41  ;;  %v2179_v35 = vor.u32 %v2362_v30, %v2176_v34 }
  0xfd   : > { %1168 = vmatmul.bf16.vlgmr.msrb.gmra.mxu1 %v3285_v45  ;;  %1323 = vrot.lane.b32.xlu0 %v3420_v36, %s2942_s10 }
  0xfe   : > { %1264 = vmatpush.bf16.msrb.mxu3 %v2179_v35 }
 0x101   : > { %v1022_v37 = vpop.f32.mrf.mxu2  ;;  %v926_v39 = vpop.f32.mrf.mxu0 }
 0x102   : > { %v1071_v38 = vpop.f32.mrf.mxu3  ;;  %v975_v42 = vpop.f32.mrf.mxu1 }
 0x103   : > { %v3426_v40 = vadd.f32 %v1071_v38, %v1022_v37  ;;  %v3428_v43 = vadd.f32 %v975_v42, %v926_v39 }
 0x105   : > { %1435 = vrot.lane.b32.xlu1 %v3426_v40, %s2942_s10  ;;  %1325 = vrot.lane.b32.xlu0 %v3428_v43, %s2942_s10 }
 0x109   : > { %v1024_v51 = vpop.f32.mrf.mxu2  ;;  %v929_v55 = vpop.f32.mrf.mxu0 }
 0x10a   : > { %v1073_v54 = vpop.f32.mrf.mxu3  ;;  %v978_v56 = vpop.f32.mrf.mxu1 }
 0x10b   : > { %v3438_v57 = vadd.f32 %v1073_v54, %v1024_v51  ;;  %v3440_v58 = vadd.f32 %v978_v56, %v929_v55  ;;  %v2326_v55 = vld [vmem:[%s3191_s29 + $0xc] sm:$0xf]  ;;  %v2032_v56 = vld [vmem:[%s3191_s29 + $0x18] sm:$0xf0] }
 0x10c   : > { %1124 = vmatmul.bf16.gmra.mxu0 %v3301_v60 }
 0x10d   : > { %1437 = vrot.lane.b32.xlu2 %v3438_v57, %s2942_s10  ;;  %1173 = vmatmul.bf16.gmra.mxu1 %v3303_v61 }
 0x10e   : > { %1327 = vrot.lane.b32.xlu1 %v3440_v58, %s2942_s10 }
 0x111   : > { %v1027_v59 = vpop.f32.mrf.mxu2  ;;  %v931_v63 = vpop.f32.mrf.mxu0 }
 0x112   : > { %v1076_v62 = vpop.f32.mrf.mxu3  ;;  %v980_v1 = vpop.f32.mrf.mxu1 }
 0x113   : > { %v3448_v0 = vadd.f32 %v1076_v62, %v1027_v59  ;;  %v3450_v2 = vadd.f32 %v980_v1, %v931_v63  ;;  %v2358_v59 = vld [vmem:[%s3191_s29 + $0x10c] sm:$0xf]  ;;  %v2035_v62 = vor.u32 %v2326_v55, %v2032_v56  ;;  %v2160_v63 = vld [vmem:[%s3191_s29 + $0x118] sm:$0xf0] }
 0x114   : > { %v2163_v1 = vor.u32 %v2358_v59, %v2160_v63 }
 0x115   : > { %1439 = vrot.lane.b32.xlu0 %v3448_v0, %s2942_s10  ;;  %1216 = vmatpush.bf16.msrb.mxu2 %v2035_v62 }
 0x116   : > { %1329 = vrot.lane.b32.xlu1 %v3450_v2, %s2942_s10  ;;  %1265 = vmatpush.bf16.msrb.mxu3 %v2163_v1 }
 0x118   : > { %1217 = vmatmul.bf16.vlgmr.msrb.gmra.mxu2 %v3281_v41 }
 0x119   : > { %v1029_v13 = vpop.f32.mrf.mxu2  ;;  %v934_v15 = vpop.f32.mrf.mxu0  ;;  %1266 = vmatmul.bf16.vlgmr.msrb.gmra.mxu3 %v3285_v45 }
 0x11a   : > { %v1078_v14 = vpop.f32.mrf.mxu3  ;;  %v983_v17 = vpop.f32.mrf.mxu1 }
 0x11b   : > { %v3460_v16 = vadd.f32 %v1078_v14, %v1029_v13  ;;  %v3462_v18 = vadd.f32 %v983_v17, %v934_v15 }
 0x11c   : > { %1129 = vmatmul.bf16.gmra.mxu0 %v3317_v8 }
 0x11d   : > { %1178 = vmatmul.bf16.gmra.mxu1 %v3319_v9  ;;  %1331 = vrot.lane.b32.xlu2 %v3462_v18, %s2942_s10 }
 0x11e   : > { %1441 = vrot.lane.b32.xlu1 %v3460_v16, %s2942_s10 }
 0x121   : > { %v1032_v19 = vpop.f32.mrf.mxu2  ;;  %v936_v23 = vpop.f32.mrf.mxu0 }
 0x122   : > { %v1081_v22 = vpop.f32.mrf.mxu3  ;;  %v985_v27 = vpop.f32.mrf.mxu1 }
 0x123   : > { %v3470_v26 = vadd.f32 %v1081_v22, %v1032_v19  ;;  %v3480_v46 = vadd.f32 %v985_v27, %v936_v23 }
 0x125   : > { %1443 = vrot.lane.b32.xlu2 %v3470_v26, %s2942_s10 }
 0x128   : > { %1222 = vmatmul.bf16.gmra.mxu2 %v3301_v60 }
 0x129   : > { %v1034_v37 = vpop.f32.mrf.mxu2  ;;  %v939_v39 = vpop.f32.mrf.mxu0  ;;  %1271 = vmatmul.bf16.gmra.mxu3 %v3303_v61 }
 0x12a   : > { %v1083_v38 = vpop.f32.mrf.mxu3  ;;  %v988_v44 = vpop.f32.mrf.mxu1 }
 0x12b   : > { %v3478_v42 = vadd.f32 %v1083_v38, %v1034_v37  ;;  %v3488_v50 = vadd.f32 %v988_v44, %v939_v39 }
 0x12c   : > { %1134 = vmatmul.bf16.gmra.mxu0 %v3333_v20 }
 0x12d   : > { %1445 = vrot.lane.b32.xlu0 %v3478_v42, %s2942_s10  ;;  %1183 = vmatmul.bf16.gmra.mxu1 %v3335_v21 }
 0x12e   : > { %1333 = vrot.lane.b32.xlu2 %v3480_v46, %s2942_s10 }
 0x131   : > { %v1037_v47 = vpop.f32.mrf.mxu2  ;;  %v941_v49 = vpop.f32.mrf.mxu0 }
 0x132   : > { %v1086_v48 = vpop.f32.mrf.mxu3  ;;  %v990_v54 = vpop.f32.mrf.mxu1 }
 0x133   : > { %v3490_v51 = vadd.f32 %v1086_v48, %v1037_v47  ;;  %v3500_v6 = vadd.f32 %v990_v54, %v941_v49 }
 0x135   : > { %1447 = vrot.lane.b32.xlu1 %v3490_v51, %s2942_s10  ;;  %1335 = vrot.lane.b32.xlu0 %v3488_v50, %s2942_s10 }
 0x138   : > { %1227 = vmatmul.bf16.gmra.mxu2 %v3317_v8 }
 0x139   : > { %v1039_v3 = vpop.f32.mrf.mxu2  ;;  %v944_v5 = vpop.f32.mrf.mxu0  ;;  %1276 = vmatmul.bf16.gmra.mxu3 %v3319_v9 }
 0x13a   : > { %v1088_v4 = vpop.f32.mrf.mxu3  ;;  %v993_v12 = vpop.f32.mrf.mxu1 }
 0x13b   : > { %v3502_v7 = vadd.f32 %v1088_v4, %v1039_v3  ;;  %v3512_v17 = vadd.f32 %v993_v12, %v944_v5 }
 0x13c   : > { %1139 = vmatmul.bf16.gmra.mxu0 %v3349_v32 }
 0x13d   : > { %1449 = vrot.lane.b32.xlu2 %v3502_v7, %s2942_s10  ;;  %1337 = vrot.lane.b32.xlu1 %v3500_v6, %s2942_s10 }
 0x13e   : > { %1188 = vmatmul.bf16.gmra.mxu1 %v3351_v33 }
 0x141   : > { %v1042_v13 = vpop.f32.mrf.mxu2  ;;  %v946_v15 = vpop.f32.mrf.mxu0 }
 0x142   : > { %v1091_v14 = vpop.f32.mrf.mxu3  ;;  %v995_v41 = vpop.f32.mrf.mxu1 }
 0x143   : > { %v3514_v19 = vadd.f32 %v1091_v14, %v1042_v13  ;;  %v3520_v28 = vadd.f32 %v995_v41, %v946_v15  ;;  %v3573_v15 = vld [vmem:[%s3203_s7 + $0x8] sm:$0xff] }
 0x144   : > { %4107 = vst [vmem:[#allocation37_spill] sm:$0xff] %v3573_v15 }
 0x145   : > { %1339 = vrot.lane.b32.xlu2 %v3512_v17, %s2942_s10  ;;  %1451 = vrot.lane.b32.xlu0 %v3514_v19, %s2942_s10 }
 0x148   : > { %1232 = vmatmul.bf16.gmra.mxu2 %v3333_v20 }
 0x149   : > { %v1044_v22 = vpop.f32.mrf.mxu2  ;;  %v949_v27 = vpop.f32.mrf.mxu0  ;;  %1281 = vmatmul.bf16.gmra.mxu3 %v3335_v21  ;;  %v3587_v21 = vld [vmem:[%s3197_s30] sm:$0xff] }
 0x14a   : > { %v1093_v23 = vpop.f32.mrf.mxu3  ;;  %v998_v29 = vpop.f32.mrf.mxu1 }
 0x14b   : > { %v3522_v45 = vadd.f32 %v1093_v23, %v1044_v22  ;;  %v3532_v35 = vadd.f32 %v998_v29, %v949_v27  ;;  %v3580_v27 = vld [vmem:[%s3203_s7] sm:$0xff]  ;;  %v3590_v29 = vld [vmem:[%s3197_s30 + $0x8] sm:$0xff] }
 0x14c   : > { %1144 = vmatmul.bf16.gmra.mxu0 %v3369_v52 }
 0x14d   : > { %1453 = vrot.lane.b32.xlu1 %v3522_v45, %s2942_s10  ;;  %1341 = vrot.lane.b32.xlu0 %v3520_v28, %s2942_s10 }
 0x14e   : > { %1193 = vmatmul.bf16.gmra.mxu1 %v3371_v53 }
 0x151   : > { %v1047_v30 = vpop.f32.mrf.mxu2  ;;  %v951_v34 = vpop.f32.mrf.mxu0 }
 0x152   : > { %v1096_v31 = vpop.f32.mrf.mxu3  ;;  %v1000_v60 = vpop.f32.mrf.mxu1 }
 0x153   : > { %v3534_v37 = vadd.f32 %v1096_v31, %v1047_v30  ;;  %v3540_v47 = vadd.f32 %v1000_v60, %v951_v34  ;;  %v1419_v60 = vmul.f32 %v3426_v40, %v3587_v21 }
 0x155   : > { %1455 = vrot.lane.b32.xlu2 %v3534_v37, %s2942_s10  ;;  %1343 = vrot.lane.b32.xlu1 %v3532_v35, %s2942_s10 }
 0x158   : > { %1237 = vmatmul.bf16.gmra.mxu2 %v3349_v32 }
 0x159   : > { %v1049_v38 = vpop.f32.mrf.mxu2  ;;  %v954_v44 = vpop.f32.mrf.mxu0  ;;  %1286 = vmatmul.bf16.gmra.mxu3 %v3351_v33  ;;  %v3648_v33 = vld [vmem:[%s3203_s7 + $0x28] sm:$0xff] }
 0x15a   : > { %v1098_v39 = vpop.f32.mrf.mxu3  ;;  %v1003_v48 = vpop.f32.mrf.mxu1 }
 0x15b   : > { %v3542_v61 = vadd.f32 %v1098_v39, %v1049_v38  ;;  %v3552_v56 = vadd.f32 %v1003_v48, %v954_v44  ;;  %v1420_v38 = vmul.f32 %v3438_v57, %v3590_v29 }
 0x15c   : > { %1149 = vmatmul.bf16.gmra.mxu0 %v3389_v10 }
 0x15d   : > { %1345 = vrot.lane.b32.xlu2 %v3540_v47, %s2942_s10  ;;  %1457 = vrot.lane.b32.xlu0 %v3542_v61, %s2942_s10 }
 0x15e   : > { %1198 = vmatmul.bf16.gmra.mxu1 %v3391_v11 }
 0x161   : > { %v1052_v49 = vpop.f32.mrf.mxu2  ;;  %v956_v55 = vpop.f32.mrf.mxu0 }
 0x162   : > { %v1101_v54 = vpop.f32.mrf.mxu3  ;;  %v1005_v8 = vpop.f32.mrf.mxu1 }
 0x163   : > { %v3554_v59 = vadd.f32 %v1101_v54, %v1052_v49  ;;  %v3560_v3 = vadd.f32 %v1005_v8, %v956_v55  ;;  %v1307_v49 = vmul.f32 %v3420_v36, %v3587_v21  ;;  %v1308_v54 = vmul.f32 %v3428_v43, %v3590_v29 }
 0x165   : > { %1459 = vrot.lane.b32.xlu1 %v3554_v59, %s2942_s10  ;;  %1347 = vrot.lane.b32.xlu0 %v3552_v56, %s2942_s10 }
 0x167   : > { %v1438_v5 = vpop.permute.xlu2 %1437 }
 0x168   : > { %v1468_v30 = vmul.f32 %v1438_v5, %v3573_v15  ;;  %1242 = vmatmul.bf16.gmra.mxu2 %v3369_v52 }
 0x169   : > { %v1054_v62 = vpop.f32.mrf.mxu2  ;;  %v959_v1 = vpop.f32.mrf.mxu0  ;;  %1291 = vmatmul.bf16.gmra.mxu3 %v3371_v53 }
 0x16a   : > { %v1103_v63 = vpop.f32.mrf.mxu3  ;;  %v1008_v4 = vpop.f32.mrf.mxu1 }
 0x16b   : > { %v3562_v9 = vadd.f32 %v1103_v63, %v1054_v62  ;;  %v3575_v41 = vadd.f32 %v1008_v4, %v959_v1  ;;  %v1484_v62 = vadd.f32 %v1468_v30, %v1420_v38  ;;  %v3634_v38 = vld [vmem:[%s3197_s30 + $0x10] sm:$0xff] }
 0x16c   : > { %1154 = vmatmul.bf16.gmra.mxu0 %v3405_v24 }
 0x16d   : > { %1461 = vrot.lane.b32.xlu2 %v3562_v9, %s2942_s10  ;;  %1349 = vrot.lane.b32.xlu1 %v3560_v3, %s2942_s10 }
 0x16e   : > { %1203 = vmatmul.bf16.gmra.mxu1 %v3407_v25 }
 0x16f   : > { %v1324_v12 = vpop.permute.xlu0 %1323 }
 0x170   : > { %v1355_v31 = vmul.f32 %v1324_v12, %v3580_v27 }
 0x171   : > { %v1057_v13 = vpop.f32.mrf.mxu2  ;;  %v961_v20 = vpop.f32.mrf.mxu0 }
 0x172   : > { %v1106_v14 = vpop.f32.mrf.mxu3  ;;  %v1010_v23 = vpop.f32.mrf.mxu1  ;;  %v1371_v57 = vadd.f32 %v1355_v31, %v1307_v49  ;;  %v3626_v31 = vld [vmem:[%s3203_s7 + $0x20] sm:$0xff]  ;;  %v3643_v49 = vld [vmem:[%s3197_s30 + $0x28] sm:$0xff] }
 0x173   : > { %v3577_v22 = vadd.f32 %v1106_v14, %v1057_v13  ;;  %v3605_v4 = vadd.f32 %v1010_v23, %v961_v20 }
 0x175   : > { %1351 = vrot.lane.b32.xlu2 %v3575_v41, %s2942_s10  ;;  %1463 = vrot.lane.b32.xlu0 %v3577_v22, %s2942_s10 }
 0x177   : > { %v1436_v34 = vpop.permute.xlu1 %1435  ;;  %v1332_v44 = vpop.permute.xlu2 %1331 }
 0x178   : > { %v1467_v39 = vmul.f32 %v1436_v34, %v3580_v27  ;;  %v1326_v48 = vpop.permute.xlu0 %1325  ;;  %v3629_v34 = vld [vmem:[%s3203_s7 + $0x10] sm:$0xff]  ;;  %1247 = vmatmul.bf16.gmra.mxu2 %v3389_v10 }
 0x179   : > { %v1356_v55 = vmul.f32 %v1326_v48, %v3573_v15  ;;  %v1059_v8 = vpop.f32.mrf.mxu2  ;;  %v1120_v1 = vpop.f32.mrf.mxu0  ;;  %v3640_v48 = vld [vmem:[%s3197_s30 + $0x20] sm:$0xff]  ;;  %1296 = vmatmul.bf16.gmra.mxu3 %v3391_v11  ;;  %v3702_v11 = vld [vmem:[%s3203_s7 + $0x30] sm:$0xff] }
 0x17a   : > { %v1483_v40 = vadd.f32 %v1467_v39, %v1419_v60  ;;  %v1108_v63 = vpop.f32.mrf.mxu3  ;;  %v1169_v13 = vpop.f32.mrf.mxu1  ;;  %v3637_v39 = vld [vmem:[%s3197_s30 + $0x18] sm:$0xff] }
 0x17b   : > { %v1372_v5 = vadd.f32 %v1356_v55, %v1308_v54  ;;  %v3607_v12 = vadd.f32 %v1108_v63, %v1059_v8  ;;  %v3609_v14 = vadd.f32 %v1169_v13, %v1120_v1  ;;  %v3651_v54 = vld [vmem:[%s3203_s7 + $0x18] sm:$0xff]  ;;  %v1359_v55 = vmul.f32 %v1332_v44, %v3626_v31 }
 0x17c   : > { %v2434_v36 = vpack.c.bf16 %v1484_v62, %v1483_v40  ;;  %v1309_v62 = vmul.f32 %v3440_v58, %v3634_v38  ;;  %v1310_v40 = vmul.f32 %v3450_v2, %v3637_v39  ;;  %v1422_v52 = vmul.f32 %v3460_v16, %v3637_v39 }
 0x17d   : > { %v2394_v43 = vpack.c.bf16 %v1372_v5, %v1371_v57  ;;  %1465 = vrot.lane.b32.xlu1 %v3607_v12, %s2942_s10  ;;  %1353 = vrot.lane.b32.xlu0 %v3605_v4, %s2942_s10  ;;  %v1311_v57 = vmul.f32 %v3462_v18, %v3640_v48  ;;  %v1312_v5 = vmul.f32 %v3480_v46, %v3643_v49 }
 0x17e   : > { %2478 = vst [vmem:[%s3618_s24 + $0x40] sm:$0xff] %v2434_v36   ;;  %1548 = vrot.lane.b32.xlu2 %v3609_v14, %s2942_s10 }
 0x17f   : > { %2395 = vst [vmem:[%s3618_s24] sm:$0xff] %v2394_v43   ;;  %v1444_v32 = vpop.permute.xlu2 %1443  ;;  %v1375_v43 = vadd.f32 %v1359_v55, %v1311_v57 }
 0x180   : > { %v1328_v20 = vpop.permute.xlu1 %1327  ;;  %v1471_v16 = vmul.f32 %v1444_v32, %v3626_v31 }
 0x181   : > { %v1122_v23 = vpop.f32.mrf.mxu0  ;;  %v1357_v8 = vmul.f32 %v1328_v20, %v3629_v34 }
 0x182   : > { %v1171_v30 = vpop.f32.mrf.mxu1 }
 0x183   : > { %v3631_v60 = vadd.f32 %v1171_v30, %v1122_v23  ;;  %v1373_v58 = vadd.f32 %v1357_v8, %v1309_v62  ;;  %v1421_v8 = vmul.f32 %v3448_v0, %v3634_v38 }
 0x185   : > { %4108 = vst [vmem:[#allocation38_spill] sm:$0xff] %v3631_v60  ;;  %1550 = vrot.lane.b32.xlu0 %v3631_v60, %s2942_s10 }
 0x187   : > { %v1440_v18 = vpop.permute.xlu0 %1439 }
 0x188   : > { %v1334_v63 = vpop.permute.xlu2 %1333  ;;  %v1330_v1 = vpop.permute.xlu1 %1329  ;;  %v1469_v46 = vmul.f32 %v1440_v18, %v3629_v34  ;;  %1252 = vmatmul.bf16.gmra.mxu2 %v3405_v24 }
 0x189   : > { %v1360_v13 = vmul.f32 %v1334_v63, %v3648_v33  ;;  %v1358_v44 = vmul.f32 %v1330_v1, %v3651_v54  ;;  %v1125_v36 = vpop.f32.mrf.mxu0  ;;  %1301 = vmatmul.bf16.gmra.mxu3 %v3407_v25 }
 0x18a   : > { %v1174_v2 = vpop.f32.mrf.mxu1  ;;  %v1485_v1 = vadd.f32 %v1469_v46, %v1421_v8 }
 0x18b   : > { %v1376_v20 = vadd.f32 %v1360_v13, %v1312_v5  ;;  %v1374_v23 = vadd.f32 %v1358_v44, %v1310_v40  ;;  %v3665_v30 = vadd.f32 %v1174_v2, %v1125_v36  ;;  %v1423_v44 = vmul.f32 %v3470_v26, %v3640_v48 }
 0x18c   : > { %v1424_v36 = vmul.f32 %v3478_v42, %v3643_v49  ;;  %v3709_v42 = vld [vmem:[%s3197_s30 + $0x30] sm:$0xff] }
 0x18d   : > { %v2404_v15 = vpack.c.bf16 %v1376_v20, %v1375_v43  ;;  %v2399_v60 = vpack.c.bf16 %v1374_v23, %v1373_v58  ;;  %1552 = vrot.lane.b32.xlu1 %v3665_v30, %s2942_s10  ;;  %v1487_v43 = vadd.f32 %v1471_v16, %v1423_v44  ;;  %v3697_v23 = vld [vmem:[%s3203_s7 + $0x38] sm:$0xff]  ;;  %v1313_v44 = vmul.f32 %v3488_v50, %v3709_v42  ;;  %v3738_v50 = vld [vmem:[%s3203_s7 + $0x40] sm:$0xff] }
 0x18f   : > { %2472 = vst [vmem:[%s3618_s24 + $0x10] sm:$0xff] %v2404_v15  }
 0x190   : > { %2471 = vst [vmem:[%s3618_s24 + $0x8] sm:$0xff] %v2399_v60   ;;  %v1442_v55 = vpop.permute.xlu1 %1441 }
 0x191   : > { %v1470_v62 = vmul.f32 %v1442_v55, %v3651_v54  ;;  %v1127_v40 = vpop.f32.mrf.mxu0  ;;  %v3712_v55 = vld [vmem:[%s3197_s30 + $0x38] sm:$0xff] }
 0x192   : > { %v1176_v63 = vpop.f32.mrf.mxu1 }
 0x193   : > { %v1486_v57 = vadd.f32 %v1470_v62, %v1422_v52  ;;  %v3679_v5 = vadd.f32 %v1176_v63, %v1127_v40  ;;  %v1425_v52 = vmul.f32 %v3490_v51, %v3709_v42  ;;  %v1426_v62 = vmul.f32 %v3502_v7, %v3712_v55 }
 0x195   : > { %v2439_v15 = vpack.c.bf16 %v1486_v57, %v1485_v1  ;;  %1554 = vrot.lane.b32.xlu2 %v3679_v5, %s2942_s10 }
 0x197   : > { %2479 = vst [vmem:[%s3618_s24 + $0x48] sm:$0xff] %v2439_v15   ;;  %v1450_v58 = vpop.permute.xlu2 %1449 }
 0x198   : > { %v1474_v26 = vmul.f32 %v1450_v58, %v3697_v23 }
 0x199   : > { %v1130_v53 = vpop.f32.mrf.mxu0 }
 0x19a   : > { %v1179_v60 = vpop.f32.mrf.mxu1  ;;  %v1490_v63 = vadd.f32 %v1474_v26, %v1426_v62  ;;  %v3746_v62 = vld [vmem:[%s3197_s30 + $0x48] sm:$0xff] }
 0x19b   : > { %v3684_v0 = vadd.f32 %v1179_v60, %v1130_v53 }
 0x19d   : > { %1556 = vrot.lane.b32.xlu0 %v3684_v0, %s2942_s10 }
 0x19f   : > { %v1446_v13 = vpop.permute.xlu0 %1445  ;;  %v1340_v60 = vpop.permute.xlu2 %1339 }
 0x1a0   : > { %v1472_v10 = vmul.f32 %v1446_v13, %v3648_v33 }
 0x1a1   : > { %v1132_v20 = vpop.f32.mrf.mxu0 }
 0x1a2   : > { %v1488_v32 = vadd.f32 %v1472_v10, %v1424_v36  ;;  %v1181_v2 = vpop.f32.mrf.mxu1  ;;  %v1314_v36 = vmul.f32 %v3500_v6, %v3712_v55 }
 0x1a3   : > { %v3699_v46 = vadd.f32 %v1181_v2, %v1132_v20 }
 0x1a4   : > { %v2444_v18 = vpack.c.bf16 %v1488_v32, %v1487_v43 }
 0x1a5   : > { %1558 = vrot.lane.b32.xlu1 %v3699_v46, %s2942_s10 }
 0x1a6   : > { %2480 = vst [vmem:[%s3618_s24 + $0x50] sm:$0xff] %v2444_v18  }
 0x1a7   : > { %v1448_v8 = vpop.permute.xlu1 %1447  ;;  %v1336_v15 = vpop.permute.xlu0 %1335 }
 0x1a8   : > { %v1473_v40 = vmul.f32 %v1448_v8, %v3702_v11  ;;  %v1361_v51 = vmul.f32 %v1336_v15, %v3702_v11  ;;  %v3741_v8 = vld [vmem:[%s3197_s30 + $0x40] sm:$0xff] }
 0x1a9   : > { %v1135_v57 = vpop.f32.mrf.mxu0  ;;  %v1315_v15 = vmul.f32 %v3512_v17, %v3741_v8 }
 0x1aa   : > { %v1489_v1 = vadd.f32 %v1473_v40, %v1425_v52  ;;  %v1184_v53 = vpop.f32.mrf.mxu1  ;;  %v1377_v10 = vadd.f32 %v1361_v51, %v1313_v44  ;;  %v3749_v40 = vld [vmem:[%s3203_s7 + $0x48] sm:$0xff] }
 0x1ab   : > { %v3719_v13 = vadd.f32 %v1184_v53, %v1135_v57  ;;  %v1427_v53 = vmul.f32 %v3514_v19, %v3741_v8 }
 0x1ac   : > { %v2449_v16 = vpack.c.bf16 %v1490_v63, %v1489_v1  ;;  %v1363_v63 = vmul.f32 %v1340_v60, %v3738_v50  ;;  %v1428_v60 = vmul.f32 %v3522_v45, %v3746_v62  ;;  %v1218_v45 = vpop.f32.mrf.mxu2 }
 0x1ad   : > { %1560 = vrot.lane.b32.xlu2 %v3719_v13, %s2942_s10 }
 0x1ae   : > { %2481 = vst [vmem:[%s3618_s24 + $0x58] sm:$0xff] %v2449_v16  }
 0x1af   : > { %v1338_v7 = vpop.permute.xlu1 %1337  ;;  %v1456_v20 = vpop.permute.xlu2 %1455 }
 0x1b0   : > { %v1362_v24 = vmul.f32 %v1338_v7, %v3697_v23  ;;  %v1316_v7 = vmul.f32 %v3520_v28, %v3746_v62 }
 0x1b1   : > { %v1137_v58 = vpop.f32.mrf.mxu0 }
 0x1b2   : > { %v1378_v43 = vadd.f32 %v1362_v24, %v1314_v36  ;;  %v1186_v32 = vpop.f32.mrf.mxu1  ;;  %v1379_v24 = vadd.f32 %v1363_v63, %v1315_v15  ;;  %v3781_v15 = vld [vmem:[%s3203_s7 + $0x50] sm:$0xff] }
 0x1b3   : > { %v3732_v18 = vadd.f32 %v1186_v32, %v1137_v58 }
 0x1b4   : > { %v2409_v2 = vpack.c.bf16 %v1378_v43, %v1377_v10  ;;  %v3766_v43 = vld [vmem:[%s3203_s7 + $0x58] sm:$0xff] }
 0x1b5   : > { %1562 = vrot.lane.b32.xlu0 %v3732_v18, %s2942_s10  ;;  %4109 = vst [vmem:[#allocation39_spill] sm:$0xff] %v3766_v43 }
 0x1b6   : > { %2473 = vst [vmem:[%s3618_s24 + $0x18] sm:$0xff] %v2409_v2  }
 0x1b7   : > { %v1452_v25 = vpop.permute.xlu0 %1451  ;;  %v1346_v1 = vpop.permute.xlu2 %1345 }
 0x1b8   : > { %v1475_v57 = vmul.f32 %v1452_v25, %v3738_v50  ;;  %v1366_v63 = vmul.f32 %v1346_v1, %v3766_v43 }
 0x1b9   : > { %v1140_v6 = vpop.f32.mrf.mxu0 }
 0x1ba   : > { %v1491_v17 = vadd.f32 %v1475_v57, %v1427_v53 }
 0x1bb   : > { %v1189_v26 = vpop.f32.mrf.mxu1 }
 0x1bc   : > { %v3743_v52 = vadd.f32 %v1189_v26, %v1140_v6  ;;  %v1267_v6 = vpop.f32.mrf.mxu3  ;;  %v3771_v26 = vld [vmem:[%s3197_s30 + $0x50] sm:$0xff] }
 0x1bd   : > { %v1268_v57 = vadd.f32 %v1267_v6, %v1218_v45  ;;  %v1429_v6 = vmul.f32 %v3534_v37, %v3771_v26 }
 0x1be   : > { %1564 = vrot.lane.b32.xlu1 %v3743_v52, %s2942_s10 }
 0x1bf   : > { %v1454_v16 = vpop.permute.xlu1 %1453  ;;  %v1342_v51 = vpop.permute.xlu0 %1341  ;;  %v1644_v1 = vpack.c.bf16 %v1268_v57, %v1268_v57 }
 0x1c0   : > { %v1476_v44 = vmul.f32 %v1454_v16, %v3749_v40  ;;  %v1364_v36 = vmul.f32 %v1342_v51, %v3749_v40  ;;  %v3774_v16 = vld [vmem:[%s3197_s30 + $0x58] sm:$0xff] }
 0x1c1   : > { %v1142_v58 = vpop.f32.mrf.mxu0  ;;  %1660 = vst [vmem:[%s3791_s14 + $0x4] sm:$0xf] %v1644_v1 }
 0x1c2   : > { %v1492_v10 = vadd.f32 %v1476_v44, %v1428_v60  ;;  %v1380_v19 = vadd.f32 %v1364_v36, %v1316_v7  ;;  %v1317_v7 = vmul.f32 %v3532_v35, %v3771_v26  ;;  %v1318_v60 = vmul.f32 %v3540_v47, %v3774_v16  ;;  %v1220_v35 = vpop.f32.mrf.mxu2 }
 0x1c3   : > { %v1191_v28 = vpop.f32.mrf.mxu1 }
 0x1c4   : > { %v2454_v32 = vpack.c.bf16 %v1492_v10, %v1491_v17  ;;  %v2414_v2 = vpack.c.bf16 %v1380_v19, %v1379_v24  ;;  %v3768_v25 = vadd.f32 %v1191_v28, %v1142_v58  ;;  %v1382_v36 = vadd.f32 %v1366_v63, %v1318_v60  ;;  %v1269_v28 = vpop.f32.mrf.mxu3  ;;  %v3809_v60 = vld [vmem:[%s3203_s7 + $0x68] sm:$0xff] }
 0x1c5   : > { %v1270_v47 = vadd.f32 %v1269_v28, %v1220_v35  ;;  %v1430_v63 = vmul.f32 %v3542_v61, %v3774_v16  ;;  %v3824_v35 = vld [vmem:[%s3197_s30 + $0x68] sm:$0xff] }
 0x1c6   : > { %2482 = vst [vmem:[%s3618_s24 + $0x60] sm:$0xff] %v2454_v32   ;;  %1566 = vrot.lane.b32.xlu2 %v3768_v25, %s2942_s10  ;;  %v1477_v32 = vmul.f32 %v1456_v20, %v3781_v15 }
 0x1c7   : > { %2474 = vst [vmem:[%s3618_s24 + $0x20] sm:$0xff] %v2414_v2   ;;  %v1462_v53 = vpop.permute.xlu2 %1461  ;;  %v1344_v51 = vpop.permute.xlu1 %1343  ;;  %v1645_v45 = vpack.c.bf16 %v1270_v47, %v1270_v47 }
 0x1c8   : > { %v1365_v44 = vmul.f32 %v1344_v51, %v3781_v15  ;;  %v1493_v20 = vadd.f32 %v1477_v32, %v1429_v6  ;;  %v1480_v61 = vmul.f32 %v1462_v53, %v3809_v60  ;;  %v1432_v32 = vmul.f32 %v3562_v9, %v3824_v35 }
 0x1c9   : > { %v1145_v17 = vpop.f32.mrf.mxu0  ;;  %1661 = vst [vmem:[%s3791_s14 + $0xc] sm:$0xf] %v1645_v45  ;;  %v1532_v6 = vmul.f32 %v3609_v14, %v3587_v21 }
 0x1ca   : > { %v1381_v24 = vadd.f32 %v1365_v44, %v1317_v7  ;;  %v1223_v37 = vpop.f32.mrf.mxu2 }
 0x1cb   : > { %v1194_v10 = vpop.f32.mrf.mxu1 }
 0x1cc   : > { %v2419_v19 = vpack.c.bf16 %v1382_v36, %v1381_v24  ;;  %v3794_v58 = vadd.f32 %v1194_v10, %v1145_v17  ;;  %v1272_v17 = vpop.f32.mrf.mxu3  ;;  %v3814_v10 = vld [vmem:[%s3203_s7 + $0x60] sm:$0xff] }
 0x1cd   : > { %v1273_v53 = vadd.f32 %v1272_v17, %v1223_v37 }
 0x1ce   : > { %2475 = vst [vmem:[%s3618_s24 + $0x28] sm:$0xff] %v2419_v19   ;;  %1568 = vrot.lane.b32.xlu0 %v3794_v58, %s2942_s10  ;;  %v3821_v19 = vld [vmem:[%s3197_s30 + $0x60] sm:$0xff] }
 0x1cf   : > { %v1458_v2 = vpop.permute.xlu0 %1457  ;;  %v3804_v57 = vpop.permute.xlu2 %1351  ;;  %v1431_v47 = vmul.f32 %v3554_v59, %v3821_v19 }
 0x1d0   : > { %v1478_v51 = vmul.f32 %v1458_v2, %v3766_v43 }
 0x1d1   : > { %v1147_v44 = vpop.f32.mrf.mxu0 }
 0x1d2   : > { %v1494_v7 = vadd.f32 %v1478_v51, %v1430_v63  ;;  %v1496_v51 = vadd.f32 %v1480_v61, %v1432_v32  ;;  %v1225_v37 = vpop.f32.mrf.mxu2  ;;  %v1320_v32 = vmul.f32 %v3560_v3, %v3824_v35 }
 0x1d3   : > { %v1196_v1 = vpop.f32.mrf.mxu1 }
 0x1d4   : > { %v2459_v36 = vpack.c.bf16 %v1494_v7, %v1493_v20  ;;  %v3811_v24 = vadd.f32 %v1196_v1, %v1147_v44  ;;  %v1646_v44 = vpack.c.bf16 %v1273_v53, %v1273_v53  ;;  %v1274_v17 = vpop.f32.mrf.mxu3 }
 0x1d5   : > { %v1275_v21 = vadd.f32 %v1274_v17, %v1225_v37  ;;  %v3858_v37 = vld [vmem:[%s3197_s30 + $0x70] sm:$0xff] }
 0x1d6   : > { %2483 = vst [vmem:[%s3618_s24 + $0x68] sm:$0xff] %v2459_v36   ;;  %1570 = vrot.lane.b32.xlu1 %v3811_v24, %s2942_s10 }
 0x1d7   : > { %v1460_v28 = vpop.permute.xlu1 %1459  ;;  %v1348_v7 = vpop.permute.xlu0 %1347  ;;  %1662 = vst [vmem:[%s3791_s14 + $0x14] sm:$0xf] %v1646_v44  ;;  %v1647_v61 = vpack.c.bf16 %v1275_v21, %v1275_v21 }
 0x1d8   : > { %v1479_v2 = vmul.f32 %v1460_v28, %v3814_v10  ;;  %v1549_v45 = vpop.permute.xlu2 %1548 }
 0x1d9   : > { %v1580_v63 = vmul.f32 %v1549_v45, %v3580_v27  ;;  %v1150_v1 = vpop.f32.mrf.mxu0  ;;  %v1367_v27 = vmul.f32 %v1348_v7, %v3814_v10  ;;  %1663 = vst [vmem:[%s3791_s14 + $0x1c] sm:$0xf] %v1647_v61 }
 0x1da   : > { %v1495_v20 = vadd.f32 %v1479_v2, %v1431_v47  ;;  %v1319_v47 = vmul.f32 %v3552_v56, %v3821_v19 }
 0x1db   : > { %v1596_v59 = vadd.f32 %v1580_v63, %v1532_v6  ;;  %v1199_v36 = vpop.f32.mrf.mxu1 }
 0x1dc   : > { %v2464_v43 = vpack.c.bf16 %v1496_v51, %v1495_v20  ;;  %v3834_v9 = vadd.f32 %v1199_v36, %v1150_v1  ;;  %v1228_v20 = vpop.f32.mrf.mxu2  ;;  %v1277_v56 = vpop.f32.mrf.mxu3 }
 0x1dd   : > { %v1612_v28 = vpack.c.bf16 %v1596_v59, %v1596_v59  ;;  %v1278_v7 = vadd.f32 %v1277_v56, %v1228_v20  ;;  %v3854_v59 = vld [vmem:[%s3203_s7 + $0x70] sm:$0xff] }
 0x1de   : > { %2484 = vst [vmem:[%s3618_s24 + $0x70] sm:$0xff] %v2464_v43   ;;  %1572 = vrot.lane.b32.xlu2 %v3834_v9, %s2942_s10  ;;  %v1383_v43 = vadd.f32 %v1367_v27, %v1319_v47  ;;  %v3863_v27 = vld [vmem:[%s3197_s30 + $0x78] sm:$0xff]  ;;  %v1369_v47 = vmul.f32 %v3804_v57, %v3854_v59 }
 0x1df   : > { %1628 = vst [vmem:[%s3791_s14] sm:$0xf] %v1612_v28  ;;  %v1350_v14 = vpop.permute.xlu1 %1349  ;;  %v1648_v44 = vpack.c.bf16 %v1278_v7, %v1278_v7  ;;  %v1434_v57 = vmul.f32 %v3607_v12, %v3863_v27 }
 0x1e0   : > { %v1368_v2 = vmul.f32 %v1350_v14, %v3809_v60  ;;  %v3866_v14 = vld [vmem:[%s3203_s7 + $0x78] sm:$0xff] }
 0x1e1   : > { %v1152_v53 = vpop.f32.mrf.mxu0  ;;  %1664 = vst [vmem:[%s3791_s14 + $0x24] sm:$0xf] %v1648_v44 }
 0x1e2   : > { %v1384_v45 = vadd.f32 %v1368_v2, %v1320_v32  ;;  %v1321_v2 = vmul.f32 %v3575_v41, %v3858_v37  ;;  %v1535_v41 = vmul.f32 %v3679_v5, %v3637_v39 }
 0x1e3   : > { %v1201_v6 = vpop.f32.mrf.mxu1 }
 0x1e4   : > { %v2424_v63 = vpack.c.bf16 %v1384_v45, %v1383_v43  ;;  %v3848_v51 = vadd.f32 %v1201_v6, %v1152_v53  ;;  %v1230_v28 = vpop.f32.mrf.mxu2  ;;  %v1279_v21 = vpop.f32.mrf.mxu3  ;;  %v1433_v43 = vmul.f32 %v3577_v22, %v3858_v37  ;;  %v1385_v7 = vadd.f32 %v1369_v47, %v1321_v2 }
 0x1e5   : > { %v1280_v61 = vadd.f32 %v1279_v21, %v1230_v28 }
 0x1e6   : > { %2476 = vst [vmem:[%s3618_s24 + $0x30] sm:$0xff] %v2424_v63   ;;  %1574 = vrot.lane.b32.xlu0 %v3848_v51, %s2942_s10  ;;  %v1322_v63 = vmul.f32 %v3605_v4, %v3863_v27 }
 0x1e7   : > { %v1464_v3 = vpop.permute.xlu0 %1463  ;;  %v1649_v6 = vpack.c.bf16 %v1280_v61, %v1280_v61 }
 0x1e8   : > { %v1481_v32 = vmul.f32 %v1464_v3, %v3854_v59 }
 0x1e9   : > { %v1155_v1 = vpop.f32.mrf.mxu0  ;;  %1665 = vst [vmem:[%s3791_s14 + $0x2c] sm:$0xf] %v1649_v6 }
 0x1ea   : > { %v1497_v44 = vadd.f32 %v1481_v32, %v1433_v43  ;;  %v4110_v32 = vld [vmem:[#allocation38_spill] sm:$0xff]  ;;  %v4111_v43 = vld [vmem:[#allocation37_spill] sm:$0xff] }
 0x1eb   : > { %v1204_v36 = vpop.f32.mrf.mxu1  ;;  %v1533_v2 = vmul.f32 %v4110_v32, %v3590_v29 }
 0x1ec   : > { %v3860_v17 = vadd.f32 %v1204_v36, %v1155_v1  ;;  %v1282_v39 = vpop.f32.mrf.mxu3 }
 0x1ee   : > { %1576 = vrot.lane.b32.xlu1 %v3860_v17, %s2942_s10 }
 0x1ef   : > { %v1466_v45 = vpop.permute.xlu1 %1465  ;;  %v1354_v53 = vpop.permute.xlu0 %1353 }
 0x1f0   : > { %v1482_v20 = vmul.f32 %v1466_v45, %v3866_v14  ;;  %v1370_v56 = vmul.f32 %v1354_v53, %v3866_v14  ;;  %v1555_v3 = vpop.permute.xlu2 %1554  ;;  %v1233_v53 = vpop.f32.mrf.mxu2 }
 0x1f1   : > { %v1583_v22 = vmul.f32 %v1555_v3, %v3651_v54  ;;  %v1157_v12 = vpop.f32.mrf.mxu0  ;;  %v1283_v54 = vadd.f32 %v1282_v39, %v1233_v53 }
 0x1f2   : > { %v1498_v4 = vadd.f32 %v1482_v20, %v1434_v57  ;;  %v1386_v1 = vadd.f32 %v1370_v56, %v1322_v63 }
 0x1f3   : > { %v1599_v36 = vadd.f32 %v1583_v22, %v1535_v41  ;;  %v1206_v28 = vpop.f32.mrf.mxu1  ;;  %v1650_v63 = vpack.c.bf16 %v1283_v54, %v1283_v54 }
 0x1f4   : > { %v2469_v21 = vpack.c.bf16 %v1498_v4, %v1497_v44  ;;  %v2429_v61 = vpack.c.bf16 %v1386_v1, %v1385_v7  ;;  %v3887_v45 = vadd.f32 %v1206_v28, %v1157_v12  ;;  %v1284_v56 = vpop.f32.mrf.mxu3  ;;  %v1534_v44 = vmul.f32 %v3665_v30, %v3634_v38 }
 0x1f5   : > { %v1615_v5 = vpack.c.bf16 %v1599_v36, %v1599_v36  ;;  %1666 = vst [vmem:[%s3791_s14 + $0x34] sm:$0xf] %v1650_v63 }
 0x1f6   : > { %2485 = vst [vmem:[%s3618_s24 + $0x78] sm:$0xff] %v2469_v21   ;;  %1578 = vrot.lane.b32.xlu2 %v3887_v45, %s2942_s10 }
 0x1f7   : > { %2477 = vst [vmem:[%s3618_s24 + $0x38] sm:$0xff] %v2429_v61   ;;  %v1551_v47 = vpop.permute.xlu0 %1550  ;;  %v1538_v61 = vmul.f32 %v3719_v13, %v3709_v42 }
 0x1f8   : > { %1631 = vst [vmem:[%s3791_s14 + $0x18] sm:$0xf] %v1615_v5  ;;  %v1581_v6 = vmul.f32 %v1551_v47, %v4111_v43  ;;  %v1235_v20 = vpop.f32.mrf.mxu2 }
 0x1f9   : > { %v1285_v41 = vadd.f32 %v1284_v56, %v1235_v20  ;;  %v1537_v20 = vmul.f32 %v3699_v46, %v3643_v49 }
 0x1fa   : > { %v1597_v57 = vadd.f32 %v1581_v6, %v1533_v2  ;;  %v1536_v2 = vmul.f32 %v3684_v0, %v3640_v48 }
 0x1fb   : > { %v1651_v22 = vpack.c.bf16 %v1285_v41, %v1285_v41 }
 0x1fc   : > { %v1613_v3 = vpack.c.bf16 %v1597_v57, %v1597_v57  ;;  %v1287_v36 = vpop.f32.mrf.mxu3 }
 0x1fd   : > { %1667 = vst [vmem:[%s3791_s14 + $0x3c] sm:$0xf] %v1651_v22 }
 0x1fe   : > { %1629 = vst [vmem:[%s3791_s14 + $0x8] sm:$0xf] %v1613_v3 }
 0x1ff   : > { %v1553_v7 = vpop.permute.xlu1 %1552 }
 0x200   : > { %v1582_v4 = vmul.f32 %v1553_v7, %v3629_v34  ;;  %v1238_v1 = vpop.f32.mrf.mxu2 }
 0x201   : > { %v1288_v28 = vadd.f32 %v1287_v36, %v1238_v1 }
 0x202   : > { %v1598_v29 = vadd.f32 %v1582_v4, %v1534_v44  ;;  %v1541_v4 = vmul.f32 %v3768_v25, %v3746_v62 }
 0x203   : > { %v1652_v39 = vpack.c.bf16 %v1288_v28, %v1288_v28  ;;  %v1539_v28 = vmul.f32 %v3732_v18, %v3712_v55 }
 0x204   : > { %v1614_v12 = vpack.c.bf16 %v1598_v29, %v1598_v29  ;;  %v1289_v38 = vpop.f32.mrf.mxu3 }
 0x205   : > { %1668 = vst [vmem:[%s3791_s14 + $0x44] sm:$0xf] %v1652_v39 }
 0x206   : > { %1630 = vst [vmem:[%s3791_s14 + $0x10] sm:$0xf] %v1614_v12 }
 0x207   : > { %v1561_v21 = vpop.permute.xlu2 %1560 }
 0x208   : > { %v1586_v53 = vmul.f32 %v1561_v21, %v3702_v11  ;;  %v1240_v34 = vpop.f32.mrf.mxu2 }
 0x209   : > { %v1290_v54 = vadd.f32 %v1289_v38, %v1240_v34  ;;  %v1540_v38 = vmul.f32 %v3743_v52, %v3741_v8 }
 0x20a   : > { %v1602_v5 = vadd.f32 %v1586_v53, %v1538_v61 }
 0x20b   : > { %v1653_v47 = vpack.c.bf16 %v1290_v54, %v1290_v54 }
 0x20c   : > { %v1618_v30 = vpack.c.bf16 %v1602_v5, %v1602_v5  ;;  %v1292_v13 = vpop.f32.mrf.mxu3 }
 0x20d   : > { %1669 = vst [vmem:[%s3791_s14 + $0x4c] sm:$0xf] %v1653_v47 }
 0x20e   : > { %1634 = vst [vmem:[%s3791_s14 + $0x30] sm:$0xf] %v1618_v30 }
 0x20f   : > { %v1557_v32 = vpop.permute.xlu0 %1556 }
 0x210   : > { %v1584_v43 = vmul.f32 %v1557_v32, %v3626_v31  ;;  %v1243_v11 = vpop.f32.mrf.mxu2 }
 0x211   : > { %v1293_v63 = vadd.f32 %v1292_v13, %v1243_v11 }
 0x212   : > { %v1600_v42 = vadd.f32 %v1584_v43, %v1536_v2  ;;  %v1544_v2 = vmul.f32 %v3834_v9, %v3821_v19 }
 0x213   : > { %v1654_v3 = vpack.c.bf16 %v1293_v63, %v1293_v63 }
 0x214   : > { %v1616_v6 = vpack.c.bf16 %v1600_v42, %v1600_v42  ;;  %v1294_v48 = vpop.f32.mrf.mxu3 }
 0x215   : > { %1670 = vst [vmem:[%s3791_s14 + $0x54] sm:$0xf] %v1654_v3  ;;  %v4112_v3 = vld [vmem:[#allocation39_spill] sm:$0xff] }
 0x216   : > { %1632 = vst [vmem:[%s3791_s14 + $0x20] sm:$0xf] %v1616_v6 }
 0x217   : > { %v1559_v57 = vpop.permute.xlu1 %1558 }
 0x218   : > { %v1585_v56 = vmul.f32 %v1559_v57, %v3648_v33  ;;  %v1245_v31 = vpop.f32.mrf.mxu2  ;;  %v1542_v57 = vmul.f32 %v3794_v58, %v3771_v26  ;;  %v1547_v26 = vmul.f32 %v3887_v45, %v3863_v27  ;;  %v1546_v27 = vmul.f32 %v3860_v17, %v3858_v37 }
 0x219   : > { %v1295_v22 = vadd.f32 %v1294_v48, %v1245_v31 }
 0x21a   : > { %v1601_v41 = vadd.f32 %v1585_v56, %v1537_v20  ;;  %v1543_v56 = vmul.f32 %v3811_v24, %v3774_v16  ;;  %v1545_v16 = vmul.f32 %v3848_v51, %v3824_v35 }
 0x21b   : > { %v1655_v7 = vpack.c.bf16 %v1295_v22, %v1295_v22 }
 0x21c   : > { %v1617_v0 = vpack.c.bf16 %v1601_v41, %v1601_v41  ;;  %v1297_v46 = vpop.f32.mrf.mxu3 }
 0x21d   : > { %1671 = vst [vmem:[%s3791_s14 + $0x5c] sm:$0xf] %v1655_v7 }
 0x21e   : > { %1633 = vst [vmem:[%s3791_s14 + $0x28] sm:$0xf] %v1617_v0 }
 0x220   : > { %v1567_v44 = vpop.permute.xlu2 %1566  ;;  %v1248_v33 = vpop.f32.mrf.mxu2 }
 0x221   : > { %v1589_v29 = vmul.f32 %v1567_v44, %v3749_v40  ;;  %v1298_v36 = vadd.f32 %v1297_v46, %v1248_v33 }
 0x223   : > { %v1605_v49 = vadd.f32 %v1589_v29, %v1541_v4  ;;  %v1656_v61 = vpack.c.bf16 %v1298_v36, %v1298_v36 }
 0x224   : > { %v1299_v40 = vpop.f32.mrf.mxu3 }
 0x225   : > { %v1621_v1 = vpack.c.bf16 %v1605_v49, %v1605_v49  ;;  %1672 = vst [vmem:[%s3791_s14 + $0x64] sm:$0xf] %v1656_v61 }
 0x227   : > { %1637 = vst [vmem:[%s3791_s14 + $0x48] sm:$0xf] %v1621_v1  ;;  %v1563_v12 = vpop.permute.xlu0 %1562 }
 0x228   : > { %v1587_v21 = vmul.f32 %v1563_v12, %v3697_v23  ;;  %v1250_v62 = vpop.f32.mrf.mxu2 }
 0x229   : > { %v1300_v39 = vadd.f32 %v1299_v40, %v1250_v62 }
 0x22a   : > { %v1603_v53 = vadd.f32 %v1587_v21, %v1539_v28 }
 0x22b   : > { %v1657_v5 = vpack.c.bf16 %v1300_v39, %v1300_v39 }
 0x22c   : > { %v1619_v25 = vpack.c.bf16 %v1603_v53, %v1603_v53  ;;  %v1302_v18 = vpop.f32.mrf.mxu3 }
 0x22d   : > { %1673 = vst [vmem:[%s3791_s14 + $0x6c] sm:$0xf] %v1657_v5 }
 0x22e   : > { %1635 = vst [vmem:[%s3791_s14 + $0x38] sm:$0xf] %v1619_v25 }
 0x230   : > { %v1565_v34 = vpop.permute.xlu1 %1564  ;;  %v1253_v23 = vpop.f32.mrf.mxu2 }
 0x231   : > { %v1588_v30 = vmul.f32 %v1565_v34, %v3738_v50  ;;  %v1303_v47 = vadd.f32 %v1302_v18, %v1253_v23 }
 0x233   : > { %v1604_v55 = vadd.f32 %v1588_v30, %v1540_v38  ;;  %v1658_v42 = vpack.c.bf16 %v1303_v47, %v1303_v47 }
 0x234   : > { %v1304_v52 = vpop.f32.mrf.mxu3 }
 0x235   : > { %v1620_v54 = vpack.c.bf16 %v1604_v55, %v1604_v55  ;;  %1674 = vst [vmem:[%s3791_s14 + $0x74] sm:$0xf] %v1658_v42 }
 0x237   : > { %1636 = vst [vmem:[%s3791_s14 + $0x40] sm:$0xf] %v1620_v54 }
 0x238   : > { %v1573_v32 = vpop.permute.xlu2 %1572  ;;  %v1255_v50 = vpop.f32.mrf.mxu2 }
 0x239   : > { %v1592_v43 = vmul.f32 %v1573_v32, %v3814_v10  ;;  %v1305_v13 = vadd.f32 %v1304_v52, %v1255_v50 }
 0x23b   : > { %v1608_v8 = vadd.f32 %v1592_v43, %v1544_v2  ;;  %v1659_v6 = vpack.c.bf16 %v1305_v13, %v1305_v13 }
 0x23d   : > { %v1624_v11 = vpack.c.bf16 %v1608_v8, %v1608_v8  ;;  %1675 = vst [vmem:[%s3791_s14 + $0x7c] sm:$0xf] %v1659_v6 }
 0x23f   : > { %1640 = vst [vmem:[%s3791_s14 + $0x60] sm:$0xf] %v1624_v11 }
 0x240   : > { %v1569_v63 = vpop.permute.xlu0 %1568 }
 0x241   : > { %v1590_v20 = vmul.f32 %v1569_v63, %v3781_v15 }
 0x243   : > { %v1606_v10 = vadd.f32 %v1590_v20, %v1542_v57 }
 0x245   : > { %v1622_v19 = vpack.c.bf16 %v1606_v10, %v1606_v10 }
 0x247   : > { %1638 = vst [vmem:[%s3791_s14 + $0x50] sm:$0xf] %v1622_v19 }
 0x248   : > { %v1571_v9 = vpop.permute.xlu1 %1570 }
 0x249   : > { %v1591_v41 = vmul.f32 %v1571_v9, %v4112_v3 }
 0x24b   : > { %v1607_v31 = vadd.f32 %v1591_v41, %v1543_v56 }
 0x24d   : > { %v1623_v48 = vpack.c.bf16 %v1607_v31, %v1607_v31 }
 0x24f   : > { %1639 = vst [vmem:[%s3791_s14 + $0x58] sm:$0xf] %v1623_v48 }
 0x250   : > { %v1579_v0 = vpop.permute.xlu2 %1578 }
 0x251   : > { %v1595_v15 = vmul.f32 %v1579_v0, %v3866_v14 }
 0x253   : > { %v1611_v58 = vadd.f32 %v1595_v15, %v1547_v26 }
 0x255   : > { %v1627_v22 = vpack.c.bf16 %v1611_v58, %v1611_v58 }
 0x257   : > { %1643 = vst [vmem:[%s3791_s14 + $0x78] sm:$0xf] %v1627_v22 }
 0x258   : > { %v1575_v7 = vpop.permute.xlu0 %1574 }
 0x259   : > { %v1593_v24 = vmul.f32 %v1575_v7, %v3809_v60 }
 0x25b   : > { %v1609_v44 = vadd.f32 %v1593_v24, %v1545_v16 }
 0x25d   : > { %v1625_v4 = vpack.c.bf16 %v1609_v44, %v1609_v44 }
 0x25f   : > { %1641 = vst [vmem:[%s3791_s14 + $0x68] sm:$0xf] %v1625_v4 }
 0x260   : > { %v1577_v29 = vpop.permute.xlu1 %1576 }
 0x261   : > { %v1594_v14 = vmul.f32 %v1577_v29, %v3854_v59 }
 0x263   : > { %v1610_v45 = vadd.f32 %v1594_v14, %v1546_v27 }
 0x265   : > { %v1626_v49 = vpack.c.bf16 %v1610_v45, %v1610_v45 }
 0x267   : > { %1642 = vst [vmem:[%s3791_s14 + $0x70] sm:$0xf] %v1626_v49 }
 0x268   : > { %s4113_s12 = sld [smem:[#allocation25_spill]]  ;;  %s1707_s26 = sshll.u32 %s3618_s24, 4  ;;  %s1708_s26 = int_to_ptr.vmem [resolvable:$true] %s1707_s26 }
 0x269   : > { %s4114_s1 = sld [smem:[#allocation26_spill]]  ;;  %s2943_s23 = smov 1024  }
 0x26a   : > { %s4116_s13 = sld [smem:[#allocation42_spill]]  ;;  %s2944_s27 = smov 2048  }
 0x26b   : > { %2494 = sst [smem:[#allocation14]] (%p3131_p0), %s2943_s23  ;;  %s2945_s29 = smov 16  }
 0x26c   : > { %2495 = sst [smem:[#allocation14 + $0x1]] (%p3131_p0), %s2944_s27  ;;  %s2946_s30 = smov 64  }
 0x26d   : > { %2496 = sst [smem:[#allocation14 + $0x2]] (%p3131_p0), %s2945_s29  ;;  %s2947_s6 = smov 4  }
 0x26e   : > { %s2295_s9 = sshll.u32 %s4113_s12, 4  ;;  %2497 = sst [smem:[#allocation14 + $0x3]] (%p3131_p0), %s2946_s30 }
 0x26f   : > { %s2389_s4 = sshll.u32 %s4114_s1, 6  ;;  %2498 = sst [smem:[#allocation14 + $0x4]] (%p3131_p0), %s2946_s30 }
 0x270   : > { %s1694_s15 = sadd.s32 %s2389_s4, %s2295_s9  ;;  %2499 = sst [smem:[#allocation14 + $0x5]] (%p3131_p0), %s2947_s6 }
 0x271   : > { %s2297_s0 = sshll.u32 %s1694_s15, 2  ;;  %s2948_s7 = smov [#allocation13]  }
 0x272   : > { %s1696_s20 = scalar_lea.hbm %s4116_s13, %s2297_s0  ;;  %s2949_s10 = smov 0  }
 0x273   : > { %s1709_s18 = sshll.u32 %s1696_s20, 4  ;;  %s2390_s5 = sshll.u32 %s4113_s12, 5  ;;  %s1710_s18 = int_to_ptr.hbm [resolvable:$true] %s1709_s18 }
 0x274   : > { %2500 = dma.general (%p3131_p0), %s1708_s26, 2048, %s1710_s18, %s1677_s17, %s2948_s7, [#allocation14], %s2949_s10, 0  }
 0x275   : > { %s1740_s24 = sshll.u32 %s3791_s14, 4  ;;  %s1737_s1 = sadd.s32 %s2390_s5, %s2389_s4  ;;  %s1741_s24 = int_to_ptr.vmem [resolvable:$true] %s1740_s24 }
 0x276   : > { %s2301_s9 = sshll.u32 %s1737_s1, 2  ;;  %s4117_s8 = sld [smem:[#allocation43_spill]] }
 0x27c   : > { %s1739_s28 = scalar_lea.hbm %s4117_s8, %s2301_s9  ;;  %s2793_s14 = scalar_lea.hbm %s4117_s8, 512 }
 0x27d   : > { %s1742_s13 = sshll.u32 %s1739_s28, 4  ;;  %s1743_s13 = int_to_ptr.hbm [resolvable:$true] %s1742_s13 }
 0x27e   : > { %s2787_s20 = sshra.s32 %s1743_s13, 4  ;;  %s2788_s20 = int_to_ptr.hbm [resolvable:$true] %s2787_s20 }
 0x27f   : > { %s2789_s23 = scalar_lea.hbm %s2788_s20, 128  ;;  %p2794_p3 = scmp.lt.s32.totalorder %s2788_s20, %s4117_s8 }
 0x280   : > { %p2790_p6 = scmp.ne.s32.totalorder %s2788_s20, %s2789_s23  ;;  %p2795_p8 = scmp.lt.s32.totalorder %s2793_s14, %s2789_s23 }
 0x282   : > { %p2791_p7 = pnand %p2790_p6, %p3131_p0  ;;  %p2796_p9 = por %p2795_p8, %p2794_p3 }
 0x284   : > { %p2792_p11 = pneg %p2791_p7 }
 0x286   : > { %p2797_p10 = pnand %p2796_p9, %p2792_p11 }
 0x288   : > { %2800 = shalt.err (!%p2797_p10)
}
 0x289   : > { %s2950_s18 = smov 128   ;;  %s2951_s27 = smov 8  }
 0x28a   : > { %2501 = dma.vmem_to_hbm [thread:$0]  (%p3131_p0), %s1741_s24, 2048, %s1743_s13, %s1682_s21, %s2950_s18, %s2950_s18, %s2951_s27  }
 0x28b PF: > { %s4118_s29 = sld [smem:[#allocation29_spill]] }
 0x28c   : > { %s4119_s30 = sld [smem:[#allocation21_spill]] }
 0x291   : > { %p2525_p12 = scmp.ge.s32.totalorder %s4118_s29, 2 }
 0x292   : > { %s1757_s7 = sand.u32 1, %s4119_s30  }
 0x293   : > { %p2518_p1 = pnand %p2525_p12, %p3149_p4  ;;  %s1758_s10 = scalar_lea.sflag [#allocation4], %s1757_s7 }
 0x295   : > { %p2519_p13 = pneg %p2518_p1 }
 0x297   : > { %2874 = dma.done.wait (%p2519_p13), %s1758_s10, 2048  }
 0x298   : > { %2876 = vsyncadd (%p2519_p13), %s1758_s10, 4294965248  ;;  %s1768_s5 = scalar_lea.sflag [#allocation12], %s1757_s7 }
 0x299   : > { %2878 = dma.done.wait (%p2519_p13), %s1768_s5, 2048  }
 0x29a   : > { %2880 = vsyncadd (%p2519_p13), %s1768_s5, 4294965248  ;;  %s31_s6 = sadd.s32 1, %s4118_s29   ;;  %s4122_s21 = sld [smem:[#allocation22_spill]] }
 0x29b   : > { %p4004_p2 = scmp.ge.s32.totalorder %s31_s6, 6   ;;  %s4123_s20 = sld [smem:[#allocation35_spill]] }
 0x29c   : > { %s4124_s16 = sld [smem:[#allocation23_spill]]  ;;  %s4132_s18 = smov %s2887_s19 }
 0x29d   : > { %s4125_s23 = sld [smem:[#allocation34_spill]]  ;;  %s4136_s24 = smov %s2911_s25 }
 0x29e   : > { %s4126_s1 = sld [smem:[#allocation24_spill]] }
 0x29f   : > { %s4127_s26 = sld [smem:[#allocation32_spill]] }
 0x2a0   : > { %s4128_s27 = sld [smem:[#allocation27_spill]]  ;;  %s4133_s19 = smov %s4122_s21 }
 0x2a1   : > { %s4129_s28 = sld [smem:[#allocation28_spill]]  ;;  %s4134_s21 = smov %s2899_s22 }
 0x2a2   : > { %s4130_s29 = sld [smem:[#allocation30_spill]]  ;;  %s4135_s22 = smov %s4124_s16 }
 0x2a3   : > { %s4131_s30 = sld [smem:[#allocation31_spill]]  ;;  %30 = sbr.rel (!%p4004_p2) target bundleno = 21 (0x15), region = 141 }
 0x2a4   : > { %s4137_s25 = smov %s4126_s1 }
 0x2a8   :  { %1774 = vsyncpa [#allocation3], 1 }
 0x2a9   :  { %1776 = vsyncpa [#allocation3 + $0x1], 1 }
 0x2aa   :  { %1777 = vsyncpa [#allocation6], 1 }
 0x2ab   :  { %1779 = vsyncpa [#allocation6 + $0x1], 1 }
 0x2ac   :  { %1780 = vsyncpa [#allocation9], 1 }
 0x2ad   :  { %1782 = vsyncpa [#allocation9 + $0x1], 1 }
 0x2ae   :  { %1783 = vsyncpa [#allocation4], 1 }
 0x2af   :  { %1785 = vsyncpa [#allocation4 + $0x1], 1 }
 0x2b0   :  { %1786 = vsyncpa [#allocation12], 1 }
 0x2b1   :  { %1788 = vsyncpa [#allocation12 + $0x1], 1 }

</bundles_post_ra>
